<compile_context>
chip_gen: v7x
topology: tpu7x:2x2x1
jax: 0.10.0
libtpu: 0.0.40
codegen_flags: <defaults>
</compile_context>

<pallas_src>
import functools

import jax
import jax.numpy as jnp
from jax.experimental import pallas as pl
from jax.experimental.pallas import tpu as pltpu


def _round_up(a, b):
    return ((a + b - 1) // b) * b


def _focal_loss_kernel(x_ref, tgt_ref, *rest, gamma, ignore_index, n_rows,
                       tiles_per_part, has_weight):
    if has_weight:
        wt_ref, out_ref, acc_loss_ref, acc_den_ref = rest
    else:
        out_ref, acc_loss_ref, acc_den_ref = rest
        wt_ref = None

    p = pl.program_id(0)          # parallel part (megacore / v7x second TC)
    i = pl.program_id(1)          # row-tile index within the part

    @pl.when(i == 0)
    def _():
        acc_loss_ref[...] = jnp.zeros_like(acc_loss_ref)
        acc_den_ref[...] = jnp.zeros_like(acc_den_ref)

    x = x_ref[...].astype(jnp.float32)      # (TN, C) -- cast after DMA
    tgt = tgt_ref[...]                      # (TN, 1) int32
    tn, c = x.shape

    # Row validity.  tile_idx is the *unclamped* grid position, so both the
    # partial last tile and a clamped duplicate tail tile (odd tile count split
    # across two parts) contribute exactly zero.
    tile_idx = p * tiles_per_part + i
    limit = n_rows - tile_idx * tn                                   # scalar
    rows_ok = jax.lax.broadcasted_iota(jnp.int32, (tn, 1), 0) < limit
    valid = rows_ok & (tgt != ignore_index)                          # (TN, 1)

    # log-softmax statistics: one full-width exp per element; everything that
    # is mathematically per-row stays per-row.
    m = jnp.max(x, axis=-1, keepdims=True)                           # (TN, 1)
    z = x - m
    ez = jnp.exp(z)                                                  # (TN, C)
    log_s = jnp.log(jnp.sum(ez, axis=-1, keepdims=True))             # (TN, 1)

    # Gather z[r, target[r]] with a single one-hot select + lane reduce.
    col = jax.lax.broadcasted_iota(jnp.int32, (tn, c), 1)
    z_t = jnp.sum(jnp.where(col == tgt, z, 0.0), axis=-1, keepdims=True)

    logpt_t = z_t - log_s                                            # (TN, 1)
    pt_t = jnp.exp(logpt_t)                                          # (TN, 1)

    if float(gamma) == int(gamma) and int(gamma) >= 0:
        q = 1.0 - pt_t
        mod = logpt_t
        for _ in range(int(gamma)):                  # plain VPU multiplies
            mod = mod * q
    else:
        q = jnp.maximum(1.0 - pt_t, 0.0)             # clamp: no NaN from pow
        mod = (q ** float(gamma)) * logpt_t

    # Per-row numerator / denominator terms; the minus sign is applied in the
    # wrapper.  jnp.where blocks NaN/Inf from garbage rows of partial tiles.
    if has_weight:
        w_t = wt_ref[...].astype(jnp.float32)                        # (TN, 1)
        num_terms = jnp.where(valid, mod * w_t, 0.0)
        den_terms = jnp.where(valid, w_t, 0.0)
    else:
        num_terms = jnp.where(valid, mod, 0.0)
        den_terms = valid.astype(jnp.float32)

    acc_loss_ref[...] += jnp.sum(num_terms, axis=0, keepdims=True)
    acc_den_ref[...] += jnp.sum(den_terms, axis=0, keepdims=True)

    @pl.when(i == pl.num_programs(1) - 1)
    def _():
        out_ref[0, 0] = jnp.sum(acc_loss_ref[...])
        out_ref[0, 1] = jnp.sum(acc_den_ref[...])


def focal_loss(x, target, weight=None, gamma=2, ignore_index=-100, tile_n=None):
    """Pallas FocalLoss forward (mean reduction). x: [N, C] float, target: [N] int."""
    N, C = x.shape
    itemsize = x.dtype.itemsize
    sub = {4: 8, 2: 16, 1: 32}.get(itemsize, 8)   # sublane packing by dtype

    t2 = target.astype(jnp.int32).reshape(N, 1)
    has_weight = weight is not None
    if has_weight:
        w = jnp.asarray(weight, jnp.float32)
        wt = w[jnp.clip(t2[:, 0], 0, C - 1)].reshape(N, 1)   # gathered in wrapper

    # --- VMEM-aware tile sizing (generation aware: v7x has only 64 MiB) -----
    lane_row = 128 * 4                      # bytes/row of any (tile_n, 1) value
    per_row_vmem = (2 * C * itemsize                     # double-buffered logits
                    + 2 * lane_row                       # double-buffered targets
                    + (2 * lane_row if has_weight else 0)
                    + 4 * C * 4                          # live (TN, C) temporaries
                    + 8 * lane_row)                      # live (TN, 1) temporaries
    try:
        info = pltpu.get_tpu_info()
        vmem_cap = int(getattr(info, "vmem_capacity_bytes", 64 * 1024 * 1024))
    except Exception:
        vmem_cap = 64 * 1024 * 1024         # conservative (v7x-sized) fallback
    budget = min(40 * 1024 * 1024, vmem_cap // 3)

    if tile_n is None:
        tile_n = budget // per_row_vmem
    tile_n = int(min(tile_n, 4096, _round_up(N, sub)))
    tile_n = max(sub, (tile_n // sub) * sub)

    n_tiles = pl.cdiv(N, tile_n)
    # Split across two "parallel" parts whenever there is more than one tile
    # (v7x second TensorCore; harmless serialization on single-TC v5e/v6e).
    num_parts = 2 if n_tiles >= 2 else 1
    tiles_per_part = pl.cdiv(n_tiles, num_parts)

    def blk_map(p, i):
        # Clamp so the padded tail step of an odd split re-reads the last tile;
        # the in-kernel row mask zeroes its contribution.
        return (jnp.minimum(p * tiles_per_part + i, n_tiles - 1), 0)

    kernel = functools.partial(
        _focal_loss_kernel, gamma=gamma, ignore_index=ignore_index,
        n_rows=N, tiles_per_part=tiles_per_part, has_weight=has_weight)

    in_specs = [pl.BlockSpec((tile_n, C), blk_map),
                pl.BlockSpec((tile_n, 1), blk_map)]
    args = [x, t2]
    if has_weight:
        in_specs.append(pl.BlockSpec((tile_n, 1), blk_map))
        args.append(wt)

    vmem_needed = tile_n * per_row_vmem + (4 << 20)
    vmem_limit = int(min(max(vmem_needed, 32 * 1024 * 1024),
                         max(vmem_cap - (2 << 20), 32 * 1024 * 1024)))

    cost = pl.CostEstimate(
        flops=8 * N * C + 24 * N,
        transcendentals=N * C + 2 * N,
        bytes_accessed=N * C * itemsize + N * 4 * (2 if has_weight else 1)
        + num_parts * 8)

    partials = pl.pallas_call(
        kernel,
        out_shape=jax.ShapeDtypeStruct((num_parts, 2), jnp.float32),
        grid_spec=pltpu.PrefetchScalarGridSpec(
            num_scalar_prefetch=0,
            grid=(num_parts, tiles_per_part),
            in_specs=in_specs,
            out_specs=pl.BlockSpec((1, 2), lambda p, i: (p, 0),
                                   memory_space=pltpu.MemorySpace.SMEM),
            scratch_shapes=[pltpu.VMEM((1, 1), jnp.float32),
                            pltpu.VMEM((1, 1), jnp.float32)],
        ),
        compiler_params=pltpu.CompilerParams(
            dimension_semantics=("parallel", "arbitrary"),
            vmem_limit_bytes=vmem_limit),
        cost_estimate=cost,
    )(*args)

    # Cross-part combine + mean (tiny, plain JAX).  Kernel accumulates
    # +sum(w * focal_logpt); loss = -num / den.  All-ignored -> 0/0 = NaN
    # (matches PyTorch nll_loss mean reduction).
    return -jnp.sum(partials[:, 0]) / jnp.sum(partials[:, 1])


def _ref_focal_loss(x, target, weight=None, gamma=2, ignore_index=-100):
    """Pure-JAX reference mirroring the PyTorch module."""
    logpt = jax.nn.log_softmax(x.astype(jnp.float32), axis=1)
    pt = jnp.exp(logpt)
    mod = (1.0 - pt) ** gamma * logpt
    valid = target != ignore_index
    safe_t = jnp.where(valid, target, 0).astype(jnp.int32)
    picked = jnp.take_along_axis(mod, safe_t[:, None], axis=1)[:, 0]
    if weight is None:
        w_t = jnp.ones_like(picked)
    else:
        w_t = jnp.asarray(weight, jnp.float32)[safe_t]
    num = jnp.sum(jnp.where(valid, -picked * w_t, 0.0))
    den = jnp.sum(jnp.where(valid, w_t, 0.0))
    return num / den


if __name__ == "__main__":
    key = jax.random.PRNGKey(0)
    k_x, k_t, k_w = jax.random.split(key, 3)

    N, C = 200, 32  # small shapes consistent with input [N, C], target [N]
    x = jax.random.normal(k_x, (N, C), dtype=jnp.float32)
    target = jax.random.randint(k_t, (N,), 0, C, dtype=jnp.int32)
    target = target.at[3].set(-100).at[77].set(-100)   # exercise ignore_index

    ref = _ref_focal_loss(x, target, gamma=2)

    # 1) default tiling (single tile, single part)
    l1 = jax.block_until_ready(focal_loss(x, target, gamma=2))
    assert jnp.allclose(l1, ref, rtol=2e-5, atol=2e-5), (l1, ref)

    # 2) multi-tile, even split across the 2-part parallel axis
    l2 = jax.block_until_ready(focal_loss(x, target, gamma=2, tile_n=64))
    assert jnp.allclose(l2, ref, rtol=2e-5, atol=2e-5), (l2, ref)

    # 3) odd tile count -> clamped duplicate tail tile on the second part
    l3 = jax.block_until_ready(focal_loss(x, target, gamma=2, tile_n=48))
    assert jnp.allclose(l3, ref, rtol=2e-5, atol=2e-5), (l3, ref)

    # 4) per-class weights (gathered in the wrapper, applied in-kernel)
    weight = jax.random.uniform(k_w, (C,), jnp.float32, 0.5, 1.5)
    ref_w = _ref_focal_loss(x, target, weight=weight, gamma=2)
    l4 = jax.block_until_ready(
        focal_loss(x, target, weight=weight, gamma=2, tile_n=64))
    assert jnp.allclose(l4, ref_w, rtol=2e-5, atol=2e-5), (l4, ref_w)

    print("KERNEL_OK")
</pallas_src>

<mosaic_0001>
module attributes {stable_mosaic.version = 11 : i64} {
  func.func @_focal_loss_kernel(%arg0: i32, %arg1: i32, %arg2: memref<200x32xf32, #tpu.memory_space<vmem>>, %arg3: memref<200x1xi32, #tpu.memory_space<vmem>>, %arg4: memref<1x2xf32, #tpu.memory_space<smem>>, %arg5: memref<1x1xf32, #tpu.memory_space<vmem>>, %arg6: memref<1x1xf32, #tpu.memory_space<vmem>>) attributes {dimension_semantics = [#tpu.dimension_semantics<parallel>, #tpu.dimension_semantics<arbitrary>], iteration_bounds = array<i64: 1, 1>, scalar_prefetch = 0 : i64, scratch_operands = 2 : i64, tpu.core_type = #tpu.core_type<tc>, window_params = [{transform_indices = @transform_0, window_bounds = array<i64: 200, 32>}, {transform_indices = @transform_1, window_bounds = array<i64: 200, 1>}, {transform_indices = @transform_2, window_bounds = array<i64: 1, 2>}]} {
    %c0_i32 = arith.constant 0 : i32
    %0 = arith.cmpi eq, %arg1, %c0_i32 : i32
    %1 = arith.extui %0 : i1 to i32
    %c0_i32_0 = arith.constant 0 : i32
    %2 = arith.cmpi ne, %1, %c0_i32_0 : i32
    scf.if %2 {
      %cst_22 = arith.constant 0.000000e+00 : f32
      %53 = vector.broadcast %cst_22 : f32 to vector<1x1xf32>
      %c0_23 = arith.constant 0 : index
      %c0_24 = arith.constant 0 : index
      %54 = vector.load %arg5[%c0_23, %c0_24] : memref<1x1xf32, #tpu.memory_space<vmem>>, vector<1x1xf32>
      tpu.vector_store %arg5[%c0_23, %c0_24], %53 {strides = array<i32>} : memref<1x1xf32, #tpu.memory_space<vmem>>, vector<1x1xf32>,
      %cst_25 = arith.constant 0.000000e+00 : f32
      %55 = vector.broadcast %cst_25 : f32 to vector<1x1xf32>
      %c0_26 = arith.constant 0 : index
      %c0_27 = arith.constant 0 : index
      %56 = vector.load %arg6[%c0_26, %c0_27] : memref<1x1xf32, #tpu.memory_space<vmem>>, vector<1x1xf32>
      tpu.vector_store %arg6[%c0_26, %c0_27], %55 {strides = array<i32>} : memref<1x1xf32, #tpu.memory_space<vmem>>, vector<1x1xf32>,
    } else {
    }
    %c0 = arith.constant 0 : index
    %c0_1 = arith.constant 0 : index
    %3 = vector.load %arg2[%c0, %c0_1] : memref<200x32xf32, #tpu.memory_space<vmem>>, vector<200x32xf32>
    %c0_2 = arith.constant 0 : index
    %c0_3 = arith.constant 0 : index
    %4 = vector.load %arg3[%c0_2, %c0_3] : memref<200x1xi32, #tpu.memory_space<vmem>>, vector<200x1xi32>
    %c1_i32 = arith.constant 1 : i32
    %5 = arith.muli %arg0, %c1_i32 : i32
    %6 = arith.addi %5, %arg1 : i32
    %c200_i32 = arith.constant 200 : i32
    %7 = arith.muli %6, %c200_i32 : i32
    %c200_i32_4 = arith.constant 200 : i32
    %8 = arith.subi %c200_i32_4, %7 : i32
    %9 = tpu.iota {dimensions = array<i32: 0>} : vector<200x1xi32>
    %10 = vector.broadcast %8 : i32 to vector<200x1xi32>
    %11 = arith.cmpi slt, %9, %10 : vector<200x1xi32>
    %c-100_i32 = arith.constant -100 : i32
    %12 = vector.broadcast %c-100_i32 : i32 to vector<200x1xi32>
    %13 = arith.cmpi ne, %4, %12 : vector<200x1xi32>
    %14 = arith.andi %11, %13 : vector<200x1xi1>
    %cst = arith.constant dense<0xFF800000> : vector<200xf32>
    %15 = vector.multi_reduction <maximumf>, %3, %cst [1] : vector<200x32xf32> to vector<200xf32>
    %16 = vector.shape_cast %15 : vector<200xf32> to vector<200x1xf32>
    %17 = vector.broadcast %16 : vector<200x1xf32> to vector<200x32xf32>
    %18 = arith.subf %3, %17 : vector<200x32xf32>
    %19 = math.exp %18 : vector<200x32xf32>
    %cst_5 = arith.constant dense<0.000000e+00> : vector<200xf32>
    %20 = vector.multi_reduction <add>, %19, %cst_5 [1] : vector<200x32xf32> to vector<200xf32>
    %21 = vector.shape_cast %20 : vector<200xf32> to vector<200x1xf32>
    %22 = math.log %21 : vector<200x1xf32>
    %23 = tpu.iota {dimensions = array<i32: 1>} : vector<200x32xi32>
    %24 = vector.broadcast %4 : vector<200x1xi32> to vector<200x32xi32>
    %25 = arith.cmpi eq, %23, %24 : vector<200x32xi32>
    %cst_6 = arith.constant 0.000000e+00 : f32
    %26 = vector.broadcast %cst_6 : f32 to vector<200x32xf32>
    %27 = arith.select %25, %18, %26 : vector<200x32xi1>, vector<200x32xf32>
    %cst_7 = arith.constant dense<0.000000e+00> : vector<200xf32>
    %28 = vector.multi_reduction <add>, %27, %cst_7 [1] : vector<200x32xf32> to vector<200xf32>
    %29 = vector.shape_cast %28 : vector<200xf32> to vector<200x1xf32>
    %30 = arith.subf %29, %22 : vector<200x1xf32>
    %31 = math.exp %30 : vector<200x1xf32>
    %cst_8 = arith.constant 1.000000e+00 : f32
    %32 = vector.broadcast %cst_8 : f32 to vector<200x1xf32>
    %33 = arith.subf %32, %31 : vector<200x1xf32>
    %34 = arith.mulf %30, %33 : vector<200x1xf32>
    %35 = arith.mulf %34, %33 : vector<200x1xf32>
    %cst_9 = arith.constant 0.000000e+00 : f32
    %36 = vector.broadcast %cst_9 : f32 to vector<200x1xf32>
    %37 = arith.select %14, %35, %36 : vector<200x1xi1>, vector<200x1xf32>
    %38 = arith.extui %14 : vector<200x1xi1> to vector<200x1xi32>
    %39 = arith.sitofp %38 : vector<200x1xi32> to vector<200x1xf32>
    %c0_10 = arith.constant 0 : index
    %c0_11 = arith.constant 0 : index
    %40 = vector.load %arg5[%c0_10, %c0_11] : memref<1x1xf32, #tpu.memory_space<vmem>>, vector<1x1xf32>
    %cst_12 = arith.constant dense<0.000000e+00> : vector<1xf32>
    %41 = vector.multi_reduction <add>, %37, %cst_12 [0] : vector<200x1xf32> to vector<1xf32>
    %42 = vector.shape_cast %41 : vector<1xf32> to vector<1x1xf32>
    %43 = arith.addf %40, %42 : vector<1x1xf32>
    %c0_13 = arith.constant 0 : index
    %c0_14 = arith.constant 0 : index
    %44 = vector.load %arg5[%c0_13, %c0_14] : memref<1x1xf32, #tpu.memory_space<vmem>>, vector<1x1xf32>
    tpu.vector_store %arg5[%c0_13, %c0_14], %43 {strides = array<i32>} : memref<1x1xf32, #tpu.memory_space<vmem>>, vector<1x1xf32>,
    %c0_15 = arith.constant 0 : index
    %c0_16 = arith.constant 0 : index
    %45 = vector.load %arg6[%c0_15, %c0_16] : memref<1x1xf32, #tpu.memory_space<vmem>>, vector<1x1xf32>
    %cst_17 = arith.constant dense<0.000000e+00> : vector<1xf32>
    %46 = vector.multi_reduction <add>, %39, %cst_17 [0] : vector<200x1xf32> to vector<1xf32>
    %47 = vector.shape_cast %46 : vector<1xf32> to vector<1x1xf32>
    %48 = arith.addf %45, %47 : vector<1x1xf32>
    %c0_18 = arith.constant 0 : index
    %c0_19 = arith.constant 0 : index
    %49 = vector.load %arg6[%c0_18, %c0_19] : memref<1x1xf32, #tpu.memory_space<vmem>>, vector<1x1xf32>
    tpu.vector_store %arg6[%c0_18, %c0_19], %48 {strides = array<i32>} : memref<1x1xf32, #tpu.memory_space<vmem>>, vector<1x1xf32>,
    %c0_i32_20 = arith.constant 0 : i32
    %50 = arith.cmpi eq, %arg1, %c0_i32_20 : i32
    %51 = arith.extui %50 : i1 to i32
    %c0_i32_21 = arith.constant 0 : i32
    %52 = arith.cmpi ne, %51, %c0_i32_21 : i32
    scf.if %52 {
      %c0_22 = arith.constant 0 : index
      %c0_23 = arith.constant 0 : index
      %53 = vector.load %arg5[%c0_22, %c0_23] : memref<1x1xf32, #tpu.memory_space<vmem>>, vector<1x1xf32>
      %54 = vector.shape_cast %53 : vector<1x1xf32> to vector<1x1x1xf32>
      %cst_24 = arith.constant dense<0.000000e+00> : vector<1xf32>
      %55 = vector.multi_reduction <add>, %54, %cst_24 [1, 2] : vector<1x1x1xf32> to vector<1xf32>
      %56 = vector.shape_cast %55 : vector<1xf32> to vector<1x1x1xf32>
      %57 = vector.extract %56[0, 0, 0] : f32 from vector<1x1x1xf32>
      %c0_25 = arith.constant 0 : index
      %c0_26 = arith.constant 0 : index
      %58 = memref.load %arg4[%c0_25, %c0_26] : memref<1x2xf32, #tpu.memory_space<smem>>
      memref.store %57, %arg4[%c0_25, %c0_26] : memref<1x2xf32, #tpu.memory_space<smem>>
      %c0_27 = arith.constant 0 : index
      %c0_28 = arith.constant 0 : index
      %59 = vector.load %arg6[%c0_27, %c0_28] : memref<1x1xf32, #tpu.memory_space<vmem>>, vector<1x1xf32>
      %60 = vector.shape_cast %59 : vector<1x1xf32> to vector<1x1x1xf32>
      %cst_29 = arith.constant dense<0.000000e+00> : vector<1xf32>
      %61 = vector.multi_reduction <add>, %60, %cst_29 [1, 2] : vector<1x1x1xf32> to vector<1xf32>
      %62 = vector.shape_cast %61 : vector<1xf32> to vector<1x1x1xf32>
      %63 = vector.extract %62[0, 0, 0] : f32 from vector<1x1x1xf32>
      %c0_30 = arith.constant 0 : index
      %c1 = arith.constant 1 : index
      %64 = memref.load %arg4[%c0_30, %c1] : memref<1x2xf32, #tpu.memory_space<smem>>
      memref.store %63, %arg4[%c0_30, %c1] : memref<1x2xf32, #tpu.memory_space<smem>>
    } else {
    }
    return
  }
  func.func @transform_0(%arg0: i32, %arg1: i32) -> (i32, i32) {
    %c1_i32 = arith.constant 1 : i32
    %0 = arith.muli %arg0, %c1_i32 : i32
    %1 = arith.addi %0, %arg1 : i32
    %c0_i32 = arith.constant 0 : i32
    %2 = arith.minsi %1, %c0_i32 : i32
    %c0_i32_0 = arith.constant 0 : i32
    %c0_i32_1 = arith.constant 0 : i32
    return %2, %c0_i32_0 : i32, i32
  }
  func.func @transform_1(%arg0: i32, %arg1: i32) -> (i32, i32) {
    %c1_i32 = arith.constant 1 : i32
    %0 = arith.muli %arg0, %c1_i32 : i32
    %1 = arith.addi %0, %arg1 : i32
    %c0_i32 = arith.constant 0 : i32
    %2 = arith.minsi %1, %c0_i32 : i32
    %c0_i32_0 = arith.constant 0 : i32
    %c0_i32_1 = arith.constant 0 : i32
    return %2, %c0_i32_0 : i32, i32
  }
  func.func @transform_2(%arg0: i32, %arg1: i32) -> (i32, i32) {
    %c0_i32 = arith.constant 0 : i32
    %c0_i32_0 = arith.constant 0 : i32
    return %arg0, %c0_i32 : i32, i32
  }
}

</mosaic_0001>

<bundles_post_ra>
// kernel: tpu_custom_call.1
= control target key start
LH: loop header
LB: loop body
LE: loop exit
PB: predicated region body
PF: predicated region fallthrough
CT: control target
= control target key end

     0   :  { %vm238_vm0 = vcmask 261120   ;;  %v1293_v6 = vmov 0   ;;  %vm942_vm1 = vcmask 7168   ;;  %vm2200_vm3 = vcmask 0   ;;  %s2174_s0 = inlined_call_operand.vmem [shape: f32[200,32], index: 0, kind: input, shape index: {}]   ;;  %s2175_s1 = inlined_call_operand.vmem [shape: s32[200,1], index: 1, kind: input, shape index: {}]   ;;  %s2176_s2 = inlined_call_operand.hbm [shape: f32[1,2], index: 2, kind: output, shape index: {}]  }
   0x1   :  { %v1314_v0 = vld [vmem:[%s2174_s0 + $0x10] sm:$0xff]  ;;  %v1319_v1 = vld [vmem:[%s2174_s0] sm:$0xff]  ;;  %v1324_v2 = vld [vmem:[%s2174_s0 + $0x18] sm:$0xff]  ;;  %1130 = vset.pattern.permute.xlu1 %v1293_v6  ;;  %1129 = vset.pattern.permute.xlu0 %v1293_v6  ;;  %v1294_v21 = vmov 0.0  }
   0x2   :  { %v245_v3 = vsel %vm238_vm0, %v1314_v0, -inf  ;;  %v239_v4 = vsel %vm238_vm0, %v1319_v1, -inf  ;;  %v1333_v5 = vld [vmem:[%s2174_s0 + $0x8] sm:$0xff]  ;;  %v248_v7 = vsel %vm238_vm0, %v1324_v2, -inf  ;;  %v1347_v10 = vld [vmem:[%s2174_s0 + $0x20] sm:$0xff]  ;;  %v1352_v11 = vld [vmem:[%s2174_s0 + $0x38] sm:$0xff] }
   0x3   :  { %246 = vmax.xlane.f32.xlu1 %v245_v3  ;;  %240 = vmax.xlane.f32.xlu0 %v239_v4  ;;  %v242_v8 = vsel %vm238_vm0, %v1333_v5, -inf  ;;  %v1342_v9 = vld [vmem:[%s2174_s0 + $0x28] sm:$0xff]  ;;  %v1357_v12 = vld [vmem:[%s2174_s0 + $0x30] sm:$0xff]  ;;  %v251_v14 = vsel %vm238_vm0, %v1347_v10, -inf  ;;  %v260_v15 = vsel %vm238_vm0, %v1352_v11, -inf  ;;  %v1376_v18 = vld [vmem:[%s2175_s1] sm:$0xff] }
   0x4   :  { %v254_v13 = vsel %vm238_vm0, %v1342_v9, -inf  ;;  %v1368_v16 = vld [vmem:[%s2175_s1 + $0x8] sm:$0xff]  ;;  %v257_v17 = vsel %vm238_vm0, %v1357_v12, -inf  ;;  %v1381_v19 = vld [vmem:[%s2175_s1 + $0x18] sm:$0xff]  ;;  %v1386_v20 = vld [vmem:[%s2175_s1 + $0x10] sm:$0xff]  ;;  %vm188_vm4 = vcmp.ne.s32.totalorder %v1376_v18, 4294967196 }
   0x5   :  { %vm189_vm2 = vcmp.ne.s32.totalorder %v1368_v16, 4294967196  ;;  %vm191_vm5 = vcmp.ne.s32.totalorder %v1381_v19, 4294967196  ;;  %vm190_vm6 = vcmp.ne.s32.totalorder %v1386_v20, 4294967196  ;;  %82 = vst.msk [vmem:[#allocation3] sm:$0x1] %vm2200_vm3, %v1294_v21  ;;  %v1097_v24 = vsel %vm188_vm4, 1.0, %v1294_v21 }
   0x6   :  { %v1098_v22 = vsel %vm189_vm2, 1.0, %v1294_v21  ;;  %81 = vst.msk [vmem:[#allocation2] sm:$0x1] %vm2200_vm3, %v1294_v21  ;;  %v1100_v25 = vsel %vm191_vm5, 1.0, %v1294_v21  ;;  %v1099_v26 = vsel %vm190_vm6, 1.0, %v1294_v21  ;;  %v1411_v27 = vld [vmem:[%s2174_s0 + $0x48] sm:$0xff] }
   0x7   :  { %249 = vmax.xlane.f32.xlu1 %v248_v7  ;;  %243 = vmax.xlane.f32.xlu0 %v242_v8  ;;  %v1003_v23 = vsel %vm942_vm1, %v1098_v22, 0.0  ;;  %v1416_v28 = vld [vmem:[%s2174_s0 + $0x40] sm:$0xff]  ;;  %v1002_v29 = vsel %vm942_vm1, %v1097_v24, 0.0  ;;  %v1005_v30 = vsel %vm942_vm1, %v1099_v26, 0.0  ;;  %v1428_v33 = vld [vmem:[%s2175_s1 + $0x28] sm:$0xff]  ;;  %v1007_v34 = vsel %vm942_vm1, %v1100_v25, 0.0 }
   0x8   :  { %v1423_v31 = vld [vmem:[%s2175_s1 + $0x20] sm:$0xff]  ;;  %v1004_v32 = vadd.f32 %v1003_v23, %v1002_v29  ;;  %vm193_vm8 = vcmp.ne.s32.totalorder %v1428_v33, 4294967196  ;;  %v266_v36 = vsel %vm238_vm0, %v1411_v27, -inf  ;;  %v263_v37 = vsel %vm238_vm0, %v1416_v28, -inf  ;;  %v1446_v40 = vld [vmem:[%s2175_s1 + $0x30] sm:$0xff]  ;;  %v1451_v41 = vld [vmem:[%s2174_s0 + $0x58] sm:$0xff] }
   0x9   :  { %vm192_vm7 = vcmp.ne.s32.totalorder %v1423_v31, 4294967196  ;;  %v1102_v39 = vsel %vm193_vm8, 1.0, %v1294_v21  ;;  %v1456_v42 = vld [vmem:[%s2174_s0 + $0x50] sm:$0xff]  ;;  %vm194_vm9 = vcmp.ne.s32.totalorder %v1446_v40, 4294967196  ;;  %v1463_v45 = vld [vmem:[%s2175_s1 + $0x38] sm:$0xff]  ;;  %v272_v48 = vsel %vm238_vm0, %v1451_v41, -inf }
   0xa   :  { %v1101_v35 = vsel %vm192_vm7, 1.0, %v1294_v21  ;;  %v1006_v38 = vadd.f32 %v1005_v30, %v1004_v32  ;;  %v1103_v46 = vsel %vm194_vm9, 1.0, %v1294_v21  ;;  %v1011_v47 = vsel %vm942_vm1, %v1102_v39, 0.0  ;;  %v1480_v52 = vld [vmem:[%s2175_s1 + $0x40] sm:$0xff]  ;;  %v1485_v53 = vld [vmem:[%s2174_s0 + $0x68] sm:$0xff] }
   0xb   :  { %255 = vmax.xlane.f32.xlu1 %v254_v13  ;;  %252 = vmax.xlane.f32.xlu0 %v251_v14  ;;  %v1009_v43 = vsel %vm942_vm1, %v1101_v35, 0.0  ;;  %vm195_vm10 = vcmp.ne.s32.totalorder %v1463_v45, 4294967196  ;;  %v269_v49 = vsel %vm238_vm0, %v1456_v42, -inf  ;;  %v1490_v54 = vld [vmem:[%s2174_s0 + $0x60] sm:$0xff]  ;;  %v1013_v55 = vsel %vm942_vm1, %v1103_v46, 0.0 }
   0xc   :  { %v1008_v44 = vadd.f32 %v1007_v34, %v1006_v38  ;;  %v1104_v51 = vsel %vm195_vm10, 1.0, %v1294_v21  ;;  %vm196_vm11 = vcmp.ne.s32.totalorder %v1480_v52, 4294967196 }
   0xe   :  { %v1010_v50 = vadd.f32 %v1009_v43, %v1008_v44 }
   0xf   :  { %261 = vmax.xlane.f32.xlu1 %v260_v15  ;;  %258 = vmax.xlane.f32.xlu0 %v257_v17 }
  0x13   :  { %267 = vmax.xlane.f32.xlu1 %v266_v36  ;;  %264 = vmax.xlane.f32.xlu0 %v263_v37 }
  0x14   :  { %7 = vsyncpa [#allocation5], 0  ;;  %v1012_v56 = vadd.f32 %v1011_v47, %v1010_v50  ;;  %v1105_v57 = vsel %vm196_vm11, 1.0, %v1294_v21  ;;  %v1500_v58 = vld [vmem:[%s2175_s1 + $0x48] sm:$0xff]  ;;  %v1015_v59 = vsel %vm942_vm1, %v1104_v51, 0.0  ;;  %v278_v60 = vsel %vm238_vm0, %v1485_v53, -inf }
  0x15   :  { %vm197_vm12 = vcmp.ne.s32.totalorder %v1500_v58, 4294967196  ;;  %v275_v61 = vsel %vm238_vm0, %v1490_v54, -inf  ;;  %v1514_v3 = vld [vmem:[%s2175_s1 + $0x50] sm:$0xff]  ;;  %v1519_v4 = vld [vmem:[%s2174_s0 + $0x78] sm:$0xff]  ;;  %v1017_v7 = vsel %vm942_vm1, %v1105_v57, 0.0  ;;  %v1548_v25 = vld [vmem:[%s2175_s1 + $0x60] sm:$0xff] }
  0x16   :  { %v1014_v62 = vadd.f32 %v1013_v55, %v1012_v56  ;;  %v1106_v63 = vsel %vm197_vm12, 1.0, %v1294_v21  ;;  %v1524_v6 = vld [vmem:[%s2174_s0 + $0x70] sm:$0xff]  ;;  %vm2185_vm13 = vcmp.ne.s32.totalorder %v1514_v3, 4294967196  ;;  %v1531_v8 = vld [vmem:[%s2175_s1 + $0x58] sm:$0xff]  ;;  %v284_v17 = vsel %vm238_vm0, %v1519_v4, -inf  ;;  %v1553_v26 = vld [vmem:[%s2174_s0 + $0x88] sm:$0xff] }
  0x17   :  { %273 = vmax.xlane.f32.xlu1 %v272_v48  ;;  %270 = vmax.xlane.f32.xlu0 %v269_v49  ;;  %v1107_v14 = vsel %vm2185_vm13, 1.0, %v1294_v21  ;;  %vm2177_vm14 = vcmp.ne.s32.totalorder %v1531_v8, 4294967196  ;;  %v1019_v15 = vsel %vm942_vm1, %v1106_v63, 0.0  ;;  %v281_v22 = vsel %vm238_vm0, %v1524_v6, -inf  ;;  %v1558_v29 = vld [vmem:[%s2174_s0 + $0x80] sm:$0xff]  ;;  %v1568_v35 = vld [vmem:[%s2175_s1 + $0x68] sm:$0xff] }
  0x18   :  { %v1016_v13 = vadd.f32 %v1015_v59, %v1014_v62  ;;  %v1108_v23 = vsel %vm2177_vm14, 1.0, %v1294_v21  ;;  %v1021_v30 = vsel %vm942_vm1, %v1107_v14, 0.0  ;;  %vm2178_vm15 = vcmp.ne.s32.totalorder %v1548_v25, 4294967196  ;;  %v1582_v44 = vld [vmem:[%s2175_s1 + $0x70] sm:$0xff]  ;;  %v1592_v47 = vld [vmem:[%s2174_s0 + $0x98] sm:$0xff]  ;;  %v1613_v59 = vld [vmem:[%s2175_s1 + $0x80] sm:$0xff] }
  0x19   :  { %v1109_v34 = vsel %vm2178_vm15, 1.0, %v1294_v21  ;;  %v1023_v36 = vsel %vm942_vm1, %v1108_v23, 0.0  ;;  %vm2179_vm14 = vcmp.ne.s32.totalorder %v1568_v35, 4294967196  ;;  %v290_v37 = vsel %vm238_vm0, %v1553_v26, -inf  ;;  %v1587_v46 = vld [vmem:[%s2174_s0 + $0x90] sm:$0xff]  ;;  %v1602_v51 = vld [vmem:[%s2175_s1 + $0x78] sm:$0xff] }
  0x1a   :  { %v1018_v24 = vadd.f32 %v1017_v7, %v1016_v13  ;;  %v287_v38 = vsel %vm238_vm0, %v1558_v29, -inf  ;;  %v1110_v43 = vsel %vm2179_vm14, 1.0, %v1294_v21  ;;  %v1025_v48 = vsel %vm942_vm1, %v1109_v34, 0.0  ;;  %v1621_v62 = vld [vmem:[%s2174_s0 + $0xa0] sm:$0xff]  ;;  %v1626_v63 = vld [vmem:[%s2174_s0 + $0xa8] sm:$0xff]  ;;  %v1655_v34 = vld [vmem:[%s2175_s1 + $0x98] sm:$0xff] }
  0x1b   :  { %279 = vmax.xlane.f32.xlu1 %v278_v60  ;;  %276 = vmax.xlane.f32.xlu0 %v275_v61  ;;  %vm2180_vm15 = vcmp.ne.s32.totalorder %v1582_v44, 4294967196  ;;  %v1027_v55 = vsel %vm942_vm1, %v1110_v43, 0.0  ;;  %vm2181_vm14 = vcmp.ne.s32.totalorder %v1602_v51, 4294967196  ;;  %v293_v56 = vsel %vm238_vm0, %v1587_v46, -inf  ;;  %2205 = vst [vmem:[#allocation7_spill] sm:$0xff] %v1626_v63  ;;  %2208 = vst [vmem:[#allocation10_spill] sm:$0xff] %v1655_v34 }
  0x1c   :  { %v1020_v32 = vadd.f32 %v1019_v15, %v1018_v24  ;;  %v1111_v50 = vsel %vm2180_vm15, 1.0, %v1294_v21  ;;  %v296_v57 = vsel %vm238_vm0, %v1592_v47, -inf  ;;  %v1112_v61 = vsel %vm2181_vm14, 1.0, %v1294_v21  ;;  %v1636_v15 = vld [vmem:[%s2175_s1 + $0x88] sm:$0xff]  ;;  %v1647_v24 = vld [vmem:[%s2175_s1 + $0x90] sm:$0xff]  ;;  %s1281_s27 = scalar_lea.hbm %s2176_s2, 16 }
  0x1d   :  { %vm2182_vm15 = vcmp.ne.s32.totalorder %v1613_v59, 4294967196  ;;  %v1029_v7 = vsel %vm942_vm1, %v1111_v50, 0.0  ;;  %2206 = vst [vmem:[#allocation8_spill] sm:$0xff] %v1636_v15  ;;  %vm2183_vm14 = vcmp.ne.s32.totalorder %v1636_v15, 4294967196  ;;  %v302_v23 = vsel %vm238_vm0, %v1626_v63, -inf  ;;  %2207 = vst [vmem:[#allocation9_spill] sm:$0xff] %v1647_v24  ;;  %p1282_p0 = scmp.ne.s32.totalorder %s2176_s2, %s1281_s27  ;;  %p1285_p1 = scmp.lt.u32.totalorder %s1281_s27, %s2176_s2 }
  0x1e   :  { %v1022_v39 = vadd.f32 %v1021_v30, %v1020_v32  ;;  %v1113_v13 = vsel %vm2182_vm15, 1.0, %v1294_v21  ;;  %v1114_v32 = vsel %vm2183_vm14, 1.0, %v1294_v21  ;;  %vm2184_vm15 = vcmp.ne.s32.totalorder %v1647_v24, 4294967196  ;;  %v1001_v63 = vld [vmem:[#allocation3] sm:$0x1] }
  0x1f   :  { %285 = vmax.xlane.f32.xlu1 %v284_v17  ;;  %282 = vmax.xlane.f32.xlu0 %v281_v22  ;;  %v1031_v17 = vsel %vm942_vm1, %v1112_v61, 0.0  ;;  %v299_v22 = vsel %vm238_vm0, %v1621_v62, -inf  ;;  %vm2187_vm14 = vcmp.ne.s32.totalorder %v1655_v34, 4294967196  ;;  %v1694_v61 = vld [vmem:[%s2174_s0 + $0xc0] sm:$0xff]  ;;  %p1287_p2 = pnand %p1285_p1, %p1282_p0 }
  0x20   :  { %v1024_v49 = vadd.f32 %v1023_v36, %v1022_v39  ;;  %v1660_v36 = vld [vmem:[%s2174_s0 + $0xb0] sm:$0xff]  ;;  %v1115_v39 = vsel %vm2184_vm15, 1.0, %v1294_v21  ;;  %2213 = vst [vmem:[#allocation15_spill] sm:$0xff] %v1694_v61 }
  0x21   :  { %2209 = vst [vmem:[#allocation11_spill] sm:$0xff] %v1660_v36 }
  0x22   :  { %v1026_v60 = vadd.f32 %v1025_v48, %v1024_v49  ;;  %v1035_v48 = vsel %vm942_vm1, %v1114_v32, 0.0  ;;  %v305_v49 = vsel %vm238_vm0, %v1660_v36, -inf }
  0x23   :  { %291 = vmax.xlane.f32.xlu1 %v290_v37  ;;  %288 = vmax.xlane.f32.xlu0 %v287_v38  ;;  %v1665_v37 = vld [vmem:[%s2174_s0 + $0xb8] sm:$0xff]  ;;  %v1033_v38 = vsel %vm942_vm1, %v1113_v13, 0.0 }
  0x24   :  { %v1028_v14 = vadd.f32 %v1027_v55, %v1026_v60  ;;  %2210 = vst [vmem:[#allocation12_spill] sm:$0xff] %v1665_v37  ;;  %v308_v50 = vsel %vm238_vm0, %v1665_v37, -inf  ;;  %v1681_v55 = vld [vmem:[%s2175_s1 + $0xa0] sm:$0xff]  ;;  %v1689_v60 = vld [vmem:[%s2175_s1 + $0xa8] sm:$0xff] }
  0x25   :  { %2211 = vst [vmem:[#allocation13_spill] sm:$0xff] %v1681_v55  ;;  %2212 = vst [vmem:[#allocation14_spill] sm:$0xff] %v1689_v60  ;;  %vm2186_vm15 = vcmp.ne.s32.totalorder %v1681_v55, 4294967196  ;;  %vm2188_vm13 = vcmp.ne.s32.totalorder %v1689_v60, 4294967196 }
  0x26   :  { %v1030_v30 = vadd.f32 %v1029_v7, %v1028_v14  ;;  %v1037_v7 = vsel %vm942_vm1, %v1115_v39, 0.0  ;;  %v1117_v13 = vsel %vm2186_vm15, 1.0, %v1294_v21  ;;  %v1118_v32 = vsel %vm2188_vm13, 1.0, %v1294_v21 }
  0x27   :  { %294 = vmax.xlane.f32.xlu1 %v293_v56  ;;  %297 = vmax.xlane.f32.xlu0 %v296_v57  ;;  %v1116_v57 = vsel %vm2187_vm14, 1.0, %v1294_v21  ;;  %v1041_v39 = vsel %vm942_vm1, %v1117_v13, 0.0 }
  0x28   :  { %v1032_v43 = vadd.f32 %v1031_v17, %v1030_v30  ;;  %v1039_v17 = vsel %vm942_vm1, %v1116_v57, 0.0 }
  0x2a   :  { %v1034_v56 = vadd.f32 %v1033_v38, %v1032_v43  ;;  %v1716_v38 = vld [vmem:[%s2175_s1 + $0xb8] sm:$0xff] }
  0x2b   :  { %300 = vmax.xlane.f32.xlu1 %v299_v22  ;;  %303 = vmax.xlane.f32.xlu0 %v302_v23  ;;  %v311_v22 = vsel %vm238_vm0, %v1694_v61, -inf  ;;  %v1708_v23 = vld [vmem:[%s2175_s1 + $0xb0] sm:$0xff]  ;;  %2215 = vst [vmem:[#allocation17_spill] sm:$0xff] %v1716_v38  ;;  %vm2203_vm14 = vcmp.ne.s32.totalorder %v1716_v38, 4294967196 }
  0x2c   :  { %v1036_v14 = vadd.f32 %v1035_v48, %v1034_v56  ;;  %2214 = vst [vmem:[#allocation16_spill] sm:$0xff] %v1708_v23  ;;  %vm2204_vm15 = vcmp.ne.s32.totalorder %v1708_v23, 4294967196  ;;  %v1727_v48 = vld [vmem:[%s2175_s1 + $0xc0] sm:$0xff]  ;;  %v1120_v57 = vsel %vm2203_vm14, 1.0, %v1294_v21 }
  0x2d   :  { %v1119_v43 = vsel %vm2204_vm15, 1.0, %v1294_v21  ;;  %2216 = vst [vmem:[#allocation18_spill] sm:$0xff] %v1727_v48  ;;  %vm2201_vm13 = vcmp.ne.s32.totalorder %v1727_v48, 4294967196  ;;  %v1047_v61 = vsel %vm942_vm1, %v1120_v57, 0.0 }
  0x2e   :  { %v1038_v30 = vadd.f32 %v1037_v7, %v1036_v14  ;;  %v1045_v7 = vsel %vm942_vm1, %v1119_v43, 0.0  ;;  %v1121_v13 = vsel %vm2201_vm13, 1.0, %v1294_v21 }
  0x2f   :  { %306 = vmax.xlane.f32.xlu1 %v305_v49  ;;  %309 = vmax.xlane.f32.xlu0 %v308_v50  ;;  %v1043_v50 = vsel %vm942_vm1, %v1118_v32, 0.0 }
  0x30   :  { %v1040_v49 = vadd.f32 %v1039_v17, %v1038_v30 }
  0x32   :  { %v1042_v56 = vadd.f32 %v1041_v39, %v1040_v49 }
  0x33   :  { %312 = vmax.xlane.f32.xlu1 %v311_v22  ;;  %v1049_v22 = vsel %vm942_vm1, %v1121_v13, 0.0 }
  0x34   :  { %v1044_v14 = vadd.f32 %v1043_v50, %v1042_v56 }
  0x36   :  { %v1046_v17 = vadd.f32 %v1045_v7, %v1044_v14 }
  0x38   :  { %v1048_v30 = vadd.f32 %v1047_v61, %v1046_v17 }
  0x3a   :  { %v1050_v37 = vadd.f32 %v1049_v22, %v1048_v30 }
  0x3c   :  { %v1051_v32 = vrot.slane %v1050_v37, 4 }
  0x3e   :  { %v1052_v39 = vadd.f32 %v1051_v32, %v1050_v37 }
  0x40   :  { %v1053_v49 = vrot.slane %v1052_v39, 2 }
  0x42   :  { %v1054_v36 = vadd.f32 %v1053_v49, %v1052_v39 }
  0x44   :  { %520 = vperm.xlu1 %1130, %v1368_v16   ;;  %v1055_v43 = vrot.slane %v1054_v36, 1 }
  0x45   :  { %517 = vperm.xlu0 %1129, %v1376_v18  }
  0x46   :  { %v1056_v21 = vadd.f32 %v1055_v43, %v1054_v36 }
  0x48   :  { %526 = vperm.xlu1 %1130, %v1381_v19   ;;  %v1057_v50 = vadd.f32 %v1056_v21, %v1001_v63 }
  0x49   :  { %523 = vperm.xlu0 %1129, %v1386_v20  }
  0x4a   :  { %1058 = vst.msk [vmem:[#allocation3] sm:$0x1] %vm2200_vm3, %v1057_v50 }
  0x4c   :  { %532 = vperm.xlu1 %1130, %v1428_v33  }
  0x4d   :  { %529 = vperm.xlu0 %1129, %v1423_v31  }
  0x50   :  { %538 = vperm.xlu1 %1130, %v1463_v45  }
  0x51   :  { %535 = vperm.xlu0 %1129, %v1446_v40  }
  0x54   :  { %550 = vperm.xlu1 %1130, %v1531_v8  }
  0x55   :  { %541 = vperm.xlu0 %1129, %v1480_v52  }
  0x58   :  { %565 = vperm.xlu1 %1130, %v1613_v59  }
  0x59   :  { %544 = vperm.xlu0 %1129, %v1500_v58  }
  0x5c   :  { %571 = vperm.xlu1 %1130, %v1647_v24  }
  0x5d   :  { %547 = vperm.xlu0 %1129, %v1514_v3  }
  0x60   :  { %577 = vperm.xlu1 %1130, %v1681_v55  }
  0x61   :  { %553 = vperm.xlu0 %1129, %v1548_v25  }
  0x64   :  { %583 = vperm.xlu1 %1130, %v1708_v23  }
  0x65   :  { %556 = vperm.xlu0 %1129, %v1568_v35  }
  0x68   :  { %589 = vperm.xlu1 %1130, %v1727_v48  }
  0x69   :  { %559 = vperm.xlu0 %1129, %v1582_v44  }
  0x6d   :  { %562 = vperm.xlu0 %1129, %v1602_v51  }
  0x71   :  { %568 = vperm.xlu0 %1129, %v1636_v15  }
  0x75   :  { %574 = vperm.xlu0 %1129, %v1655_v34  }
  0x79   :  { %580 = vperm.xlu0 %1129, %v1689_v60  }
  0x7d   :  { %586 = vperm.xlu0 %1129, %v1716_v38  }
  0x90   :  { %v247_v63 = vpop.xlane.xlu1 %246  ;;  %v241_v36 = vpop.xlane.xlu0 %240 }
  0x91   :  { %v1767_v37 = vsub.f32 %v1314_v0, %v247_v63  ;;  %v1770_v61 = vsub.f32 %v1319_v1, %v241_v36 }
  0x93   :  { %v339_v56 = vmul.f32 1.442695, %v1770_v61  ;;  %v343_v57 = vmul.f32 1.442695, %v1767_v37 }
  0x94   :  { %v250_v7 = vpop.xlane.xlu1 %249  ;;  %v244_v13 = vpop.xlane.xlu0 %243 }
  0x95   :  { %v1775_v14 = vsub.f32 %v1324_v2, %v250_v7  ;;  %v1778_v17 = vsub.f32 %v1333_v5, %v244_v13  ;;  %1131 = vpow2.f32 %v339_v56 }
  0x96   :  { %1133 = vpow2.f32 %v343_v57 }
  0x97   :  { %v341_v22 = vmul.f32 1.442695, %v1778_v17  ;;  %v345_v0 = vmul.f32 1.442695, %v1775_v14 }
  0x98   :  { %v256_v1 = vpop.xlane.xlu1 %255  ;;  %v253_v30 = vpop.xlane.xlu0 %252 }
  0x99   :  { %v1783_v32 = vsub.f32 %v1342_v9, %v256_v1  ;;  %v1786_v39 = vsub.f32 %v1347_v10, %v253_v30  ;;  %1135 = vpow2.f32 %v341_v22 }
  0x9a   :  { %1137 = vpow2.f32 %v345_v0 }
  0x9b   :  { %v347_v2 = vmul.f32 1.442695, %v1786_v39  ;;  %v349_v5 = vmul.f32 1.442695, %v1783_v32 }
  0x9c   :  { %v262_v49 = vpop.xlane.xlu1 %261  ;;  %v259_v43 = vpop.xlane.xlu0 %258 }
  0x9d   :  { %v1791_v21 = vsub.f32 %v1352_v11, %v262_v49  ;;  %v1794_v50 = vsub.f32 %v1357_v12, %v259_v43  ;;  %1139 = vpow2.f32 %v347_v2 }
  0x9e   :  { %1141 = vpow2.f32 %v349_v5 }
  0x9f   :  { %v351_v9 = vmul.f32 1.442695, %v1794_v50  ;;  %v1132_v63 = vpop.eup %1131  ;;  %v353_v10 = vmul.f32 1.442695, %v1791_v21 }
  0xa0   :  { %v268_v36 = vpop.xlane.xlu1 %267  ;;  %v265_v56 = vpop.xlane.xlu0 %264  ;;  %v389_v57 = vsel %vm238_vm0, %v1132_v63, 0.0 }
  0xa1   :  { %v1134_v7 = vpop.eup %1133  ;;  %1143 = vpow2.f32 %v351_v9  ;;  %390 = vadd.xlane.f32.xlu0 %v389_v57 }
  0xa2   :  { %1145 = vpow2.f32 %v353_v10  ;;  %v395_v12 = vsel %vm238_vm0, %v1134_v7, 0.0 }
  0xa3   :  { %v1136_v13 = vpop.eup %1135 }
  0xa4   :  { %v274_v11 = vpop.xlane.xlu1 %273  ;;  %v271_v22 = vpop.xlane.xlu0 %270  ;;  %v392_v0 = vsel %vm238_vm0, %v1136_v13, 0.0 }
  0xa5   :  { %v1138_v1 = vpop.eup %1137  ;;  %396 = vadd.xlane.f32.xlu0 %v395_v12  ;;  %393 = vadd.xlane.f32.xlu1 %v392_v0  ;;  %v1831_v23 = vsub.f32 %v1456_v42, %v271_v22 }
  0xa6   :  { %v398_v49 = vsel %vm238_vm0, %v1138_v1, 0.0 }
  0xa7   :  { %v1140_v30 = vpop.eup %1139  ;;  %v359_v60 = vmul.f32 1.442695, %v1831_v23 }
  0xa8   :  { %v280_v2 = vpop.xlane.xlu1 %279  ;;  %v277_v5 = vpop.xlane.xlu0 %276  ;;  %v401_v43 = vsel %vm238_vm0, %v1140_v30, 0.0 }
  0xa9   :  { %v1142_v9 = vpop.eup %1141  ;;  %399 = vadd.xlane.f32.xlu0 %v398_v49  ;;  %402 = vadd.xlane.f32.xlu1 %v401_v43  ;;  %v1817_v43 = vsub.f32 %v1416_v28, %v265_v56  ;;  %v1847_v42 = vsub.f32 %v1490_v54, %v277_v5  ;;  %v1856_v54 = vsub.f32 %v1485_v53, %v280_v2 }
  0xaa   :  { %v404_v7 = vsel %vm238_vm0, %v1142_v9, 0.0 }
  0xab   :  { %v1144_v63 = vpop.eup %1143 }
  0xac   :  { %v1803_v10 = vpop.xlane.xlu1 %285  ;;  %v283_v57 = vpop.xlane.xlu0 %282  ;;  %v407_v13 = vsel %vm238_vm0, %v1144_v63, 0.0  ;;  %v1822_v63 = vsub.f32 %v1411_v27, %v268_v36  ;;  %v1838_v27 = vsub.f32 %v1451_v41, %v274_v11 }
  0xad   :  { %v1146_v12 = vpop.eup %1145  ;;  %405 = vadd.xlane.f32.xlu0 %v404_v7  ;;  %408 = vadd.xlane.f32.xlu1 %v407_v13  ;;  %v355_v7 = vmul.f32 1.442695, %v1817_v43  ;;  %v1866_v53 = vsub.f32 %v1524_v6, %v283_v57 }
  0xae   :  { %v410_v1 = vsel %vm238_vm0, %v1146_v12, 0.0  ;;  %v514_v12 = vlaneseq  ;;  %v361_v24 = vmul.f32 1.442695, %v1838_v27 }
  0xaf   :  { %1147 = vpow2.f32 %v355_v7  ;;  %v367_v6 = vmul.f32 1.442695, %v1866_v53 }
  0xb0   :  { %v1807_v0 = vpop.xlane.xlu1 %291  ;;  %v1809_v48 = vpop.xlane.xlu0 %288  ;;  %v1840_v36 = vand.u32 127, %v514_v12 }
  0xb1   :  { %411 = vadd.xlane.f32.xlu0 %v410_v1  ;;  %v357_v1 = vmul.f32 1.442695, %v1822_v63 }
  0xb3   :  { %1149 = vpow2.f32 %v357_v1 }
  0xb4   :  { %v1812_v30 = vpop.xlane.xlu1 %294  ;;  %v1814_v49 = vpop.xlane.xlu0 %297  ;;  %1151 = vpow2.f32 %v359_v60 }
  0xb5   :  { %1153 = vpow2.f32 %v361_v24 }
  0xb8   :  { %v1819_v9 = vpop.xlane.xlu1 %300  ;;  %v1825_v13 = vpop.xlane.xlu0 %303 }
  0xb9   :  { %v1148_v12 = vpop.eup %1147 }
  0xba   :  { %v413_v60 = vsel %vm238_vm0, %v1148_v12, 0.0 }
  0xbc   :  { %v1827_v38 = vpop.xlane.xlu1 %306  ;;  %v1833_v28 = vpop.xlane.xlu0 %309 }
  0xc0   :  { %v1835_v56 = vpop.xlane.xlu1 %312 }
  0xc4   :  { %v521_v55 = vpop.permute.xlu1 %520  ;;  %v518_v34 = vpop.permute.xlu0 %517 }
  0xc5   :  { %vm592_vm3 = vcmp.eq.s32.totalorder %v1840_v36, %v521_v55  ;;  %vm591_vm13 = vcmp.eq.s32.totalorder %v1840_v36, %v518_v34  ;;  %v363_v34 = vmul.f32 1.442695, %v1847_v42 }
  0xc6   :  { %v617_v41 = vsel %vm592_vm3, %v1778_v17, 0.0  ;;  %v616_v11 = vsel %vm591_vm13, %v1770_v61, 0.0  ;;  %v1150_v17 = vpop.eup %1149 }
  0xc7   :  { %v644_v22 = vsel %vm238_vm0, %v617_v41, 0.0  ;;  %v641_v7 = vsel %vm238_vm0, %v616_v11, 0.0  ;;  %1155 = vpow2.f32 %v363_v34  ;;  %v1152_v11 = vpop.eup %1151 }
  0xc8   :  { %v527_v1 = vpop.permute.xlu1 %526  ;;  %645 = vadd.xlane.f32.xlu0 %v644_v22  ;;  %642 = vadd.xlane.f32.xlu1 %v641_v7  ;;  %v524_v15 = vpop.permute.xlu0 %523  ;;  %v419_v57 = vsel %vm238_vm0, %v1152_v11, 0.0 }
  0xc9   :  { %vm594_vm14 = vcmp.eq.s32.totalorder %v1840_v36, %v527_v1  ;;  %vm593_vm15 = vcmp.eq.s32.totalorder %v1840_v36, %v524_v15  ;;  %v365_v15 = vmul.f32 1.442695, %v1856_v54  ;;  %v1154_v1 = vpop.eup %1153 }
  0xca   :  { %v618_v55 = vsel %vm593_vm15, %v1767_v37, 0.0  ;;  %v619_v41 = vsel %vm594_vm14, %v1775_v14, 0.0  ;;  %v416_v37 = vsel %vm238_vm0, %v1150_v17, 0.0  ;;  %v1874_v14 = vsub.f32 %v1519_v4, %v1803_v10 }
  0xcb   :  { %v647_v61 = vsel %vm238_vm0, %v618_v55, 0.0  ;;  %v650_v2 = vsel %vm238_vm0, %v619_v41, 0.0  ;;  %1157 = vpow2.f32 %v365_v15  ;;  %v1884_v4 = vsub.f32 %v1558_v29, %v1809_v48 }
  0xcc   :  { %414 = vadd.xlane.f32.xlu1 %v413_v60  ;;  %648 = vadd.xlane.f32.xlu0 %v647_v61  ;;  %v530_v5 = vpop.permute.xlu0 %529  ;;  %v533_v24 = vpop.permute.xlu1 %532  ;;  %1159 = vpow2.f32 %v367_v6  ;;  %v422_v60 = vsel %vm238_vm0, %v1154_v1, 0.0  ;;  %v1892_v41 = vsub.f32 %v1553_v26, %v1807_v0  ;;  %v1902_v26 = vsub.f32 %v1587_v46, %v1812_v30 }
  0xcd   :  { %vm595_vm3 = vcmp.eq.s32.totalorder %v1840_v36, %v530_v5  ;;  %vm596_vm13 = vcmp.eq.s32.totalorder %v1840_v36, %v533_v24  ;;  %v371_v29 = vmul.f32 1.442695, %v1884_v4  ;;  %v1911_v6 = vsub.f32 %v1592_v47, %v1814_v49 }
  0xce   :  { %v620_v7 = vsel %vm595_vm3, %v1786_v39, 0.0  ;;  %v621_v55 = vsel %vm596_vm13, %v1783_v32, 0.0  ;;  %v369_v39 = vmul.f32 1.442695, %v1874_v14 }
  0xcf   :  { %v653_v12 = vsel %vm238_vm0, %v620_v7, 0.0  ;;  %v656_v61 = vsel %vm238_vm0, %v621_v55, 0.0 }
  0xd0   :  { %417 = vadd.xlane.f32.xlu1 %v416_v37  ;;  %651 = vadd.xlane.f32.xlu0 %v650_v2  ;;  %v536_v22 = vpop.permute.xlu0 %535  ;;  %v539_v10 = vpop.permute.xlu1 %538  ;;  %1161 = vpow2.f32 %v369_v39 }
  0xd1   :  { %vm597_vm14 = vcmp.eq.s32.totalorder %v1840_v36, %v536_v22  ;;  %v1156_v17 = vpop.eup %1155  ;;  %vm598_vm15 = vcmp.eq.s32.totalorder %v1840_v36, %v539_v10  ;;  %1163 = vpow2.f32 %v371_v29  ;;  %v2218_v29 = vld [vmem:[#allocation11_spill] sm:$0xff] }
  0xd2   :  { %v622_v32 = vsel %vm597_vm14, %v1794_v50, 0.0  ;;  %v425_v48 = vsel %vm238_vm0, %v1156_v17, 0.0  ;;  %v623_v37 = vsel %vm598_vm15, %v1791_v21, 0.0  ;;  %v373_v50 = vmul.f32 1.442695, %v1892_v41 }
  0xd3   :  { %v659_v15 = vsel %vm238_vm0, %v622_v32, 0.0  ;;  %v662_v11 = vsel %vm238_vm0, %v623_v37, 0.0  ;;  %v375_v21 = vmul.f32 1.442695, %v1902_v26 }
  0xd4   :  { %420 = vadd.xlane.f32.xlu1 %v419_v57  ;;  %654 = vadd.xlane.f32.xlu0 %v653_v12  ;;  %v542_v34 = vpop.permute.xlu0 %541  ;;  %1165 = vpow2.f32 %v373_v50  ;;  %v551_v47 = vpop.permute.xlu1 %550 }
  0xd5   :  { %v1158_v24 = vpop.eup %1157  ;;  %vm599_vm3 = vcmp.eq.s32.totalorder %v1840_v36, %v542_v34  ;;  %1167 = vpow2.f32 %v375_v21  ;;  %v1920_v34 = vsub.f32 %v1621_v62, %v1819_v9  ;;  %vm602_vm15 = vcmp.eq.s32.totalorder %v1840_v36, %v551_v47  ;;  %v2220_v21 = vld [vmem:[#allocation15_spill] sm:$0xff] }
  0xd6   :  { %v428_v2 = vsel %vm238_vm0, %v1158_v24, 0.0  ;;  %v1160_v22 = vpop.eup %1159  ;;  %v624_v7 = vsel %vm599_vm3, %v1817_v43, 0.0  ;;  %v377_v43 = vmul.f32 1.442695, %v1911_v6  ;;  %v627_v32 = vsel %vm602_vm15, %v1838_v27, 0.0 }
  0xd7   :  { %v431_v46 = vsel %vm238_vm0, %v1160_v22, 0.0  ;;  %v665_v30 = vsel %vm238_vm0, %v624_v7, 0.0 }
  0xd8   :  { %423 = vadd.xlane.f32.xlu1 %v422_v60  ;;  %657 = vadd.xlane.f32.xlu0 %v656_v61  ;;  %v545_v5 = vpop.permute.xlu0 %544  ;;  %1169 = vpow2.f32 %v377_v43  ;;  %v2217_v60 = vld [vmem:[#allocation7_spill] sm:$0xff] }
  0xd9   :  { %vm600_vm13 = vcmp.eq.s32.totalorder %v1840_v36, %v545_v5  ;;  %v1929_v61 = vsub.f32 %v2217_v60, %v1825_v13 }
  0xda   :  { %v1162_v57 = vpop.eup %1161  ;;  %v625_v1 = vsel %vm600_vm13, %v1822_v63, 0.0  ;;  %v379_v63 = vmul.f32 1.442695, %v1920_v34 }
  0xdb   :  { %v434_v49 = vsel %vm238_vm0, %v1162_v57, 0.0  ;;  %v668_v55 = vsel %vm238_vm0, %v625_v1, 0.0  ;;  %v1164_v39 = vpop.eup %1163 }
  0xdc   :  { %426 = vadd.xlane.f32.xlu1 %v425_v48  ;;  %660 = vadd.xlane.f32.xlu0 %v659_v15  ;;  %v548_v0 = vpop.permute.xlu0 %547  ;;  %v437_v9 = vsel %vm238_vm0, %v1164_v39, 0.0  ;;  %1171 = vpow2.f32 %v379_v63  ;;  %v1938_v48 = vsub.f32 %v2218_v29, %v1827_v38  ;;  %v674_v15 = vsel %vm238_vm0, %v627_v32, 0.0 }
  0xdd   :  { %vm601_vm14 = vcmp.eq.s32.totalorder %v1840_v36, %v548_v0  ;;  %v2219_v0 = vld [vmem:[#allocation12_spill] sm:$0xff] }
  0xde   :  { %v626_v10 = vsel %vm601_vm14, %v1831_v23, 0.0  ;;  %v1166_v5 = vpop.eup %1165  ;;  %v381_v23 = vmul.f32 1.442695, %v1929_v61  ;;  %v383_v27 = vmul.f32 1.442695, %v1938_v48 }
  0xdf   :  { %v671_v17 = vsel %vm238_vm0, %v626_v10, 0.0  ;;  %v440_v13 = vsel %vm238_vm0, %v1166_v5, 0.0  ;;  %v1168_v24 = vpop.eup %1167 }
  0xe0   :  { %429 = vadd.xlane.f32.xlu1 %v428_v2  ;;  %663 = vadd.xlane.f32.xlu0 %v662_v11  ;;  %v554_v12 = vpop.permute.xlu0 %553  ;;  %1173 = vpow2.f32 %v381_v23  ;;  %v1947_v2 = vsub.f32 %v2219_v0, %v1833_v28  ;;  %v443_v38 = vsel %vm238_vm0, %v1168_v24, 0.0  ;;  %v566_v28 = vpop.permute.xlu1 %565 }
  0xe1   :  { %vm603_vm3 = vcmp.eq.s32.totalorder %v1840_v36, %v554_v12  ;;  %1175 = vpow2.f32 %v383_v27 }
  0xe2   :  { %v628_v50 = vsel %vm603_vm3, %v1847_v42, 0.0  ;;  %v1170_v22 = vpop.eup %1169  ;;  %v385_v42 = vmul.f32 1.442695, %v1947_v2  ;;  %vm607_vm3 = vcmp.eq.s32.totalorder %v1840_v36, %v566_v28 }
  0xe3   :  { %v677_v11 = vsel %vm238_vm0, %v628_v50, 0.0  ;;  %v446_v57 = vsel %vm238_vm0, %v1170_v22, 0.0 }
  0xe4   :  { %432 = vadd.xlane.f32.xlu1 %v431_v46  ;;  %666 = vadd.xlane.f32.xlu0 %v665_v30  ;;  %v557_v62 = vpop.permute.xlu0 %556  ;;  %v1956_v46 = vsub.f32 %v2220_v21, %v1835_v56  ;;  %1177 = vpow2.f32 %v385_v42 }
  0xe5   :  { %vm604_vm13 = vcmp.eq.s32.totalorder %v1840_v36, %v557_v62  ;;  %v632_v62 = vsel %vm607_vm3, %v1884_v4, 0.0 }
  0xe6   :  { %v629_v7 = vsel %vm604_vm13, %v1856_v54, 0.0  ;;  %v1172_v1 = vpop.eup %1171  ;;  %v387_v43 = vmul.f32 1.442695, %v1956_v46 }
  0xe7   :  { %v680_v12 = vsel %vm238_vm0, %v629_v7, 0.0  ;;  %v449_v47 = vsel %vm238_vm0, %v1172_v1, 0.0 }
  0xe8   :  { %435 = vadd.xlane.f32.xlu1 %v434_v49  ;;  %669 = vadd.xlane.f32.xlu0 %v668_v55  ;;  %v560_v37 = vpop.permute.xlu0 %559  ;;  %v572_v55 = vpop.permute.xlu1 %571  ;;  %1179 = vpow2.f32 %v387_v43 }
  0xe9   :  { %vm605_vm14 = vcmp.eq.s32.totalorder %v1840_v36, %v560_v37 }
  0xea   :  { %v630_v54 = vsel %vm605_vm14, %v1866_v53, 0.0  ;;  %v1174_v49 = vpop.eup %1173  ;;  %vm609_vm14 = vcmp.eq.s32.totalorder %v1840_v36, %v572_v55 }
  0xeb   :  { %v683_v56 = vsel %vm238_vm0, %v630_v54, 0.0  ;;  %v452_v53 = vsel %vm238_vm0, %v1174_v49, 0.0  ;;  %v1176_v60 = vpop.eup %1175 }
  0xec   :  { %438 = vadd.xlane.f32.xlu1 %v437_v9  ;;  %672 = vadd.xlane.f32.xlu0 %v671_v17  ;;  %v563_v30 = vpop.permute.xlu0 %562  ;;  %v578_v9 = vpop.permute.xlu1 %577  ;;  %v455_v5 = vsel %vm238_vm0, %v1176_v60, 0.0 }
  0xed   :  { %vm606_vm15 = vcmp.eq.s32.totalorder %v1840_v36, %v563_v30 }
  0xee   :  { %v631_v10 = vsel %vm606_vm15, %v1874_v14, 0.0  ;;  %v689_v14 = vsel %vm238_vm0, %v632_v62, 0.0  ;;  %v1178_v32 = vpop.eup %1177  ;;  %vm611_vm15 = vcmp.eq.s32.totalorder %v1840_v36, %v578_v9 }
  0xef   :  { %v686_v63 = vsel %vm238_vm0, %v631_v10, 0.0  ;;  %v458_v29 = vsel %vm238_vm0, %v1178_v32, 0.0  ;;  %v636_v27 = vsel %vm611_vm15, %v1920_v34, 0.0 }
  0xf0   :  { %441 = vadd.xlane.f32.xlu1 %v440_v13  ;;  %675 = vadd.xlane.f32.xlu0 %v674_v15  ;;  %v569_v39 = vpop.permute.xlu0 %568  ;;  %v634_v15 = vsel %vm609_vm14, %v1902_v26, 0.0  ;;  %v584_v24 = vpop.permute.xlu1 %583 }
  0xf1   :  { %vm608_vm13 = vcmp.eq.s32.totalorder %v1840_v36, %v569_v39 }
  0xf2   :  { %v633_v23 = vsel %vm608_vm13, %v1892_v41, 0.0  ;;  %v1180_v4 = vpop.eup %1179  ;;  %v695_v41 = vsel %vm238_vm0, %v634_v15, 0.0  ;;  %vm613_vm13 = vcmp.eq.s32.totalorder %v1840_v36, %v584_v24 }
  0xf3   :  { %v692_v13 = vsel %vm238_vm0, %v633_v23, 0.0  ;;  %v461_v50 = vsel %vm238_vm0, %v1180_v4, 0.0  ;;  %v638_v7 = vsel %vm613_vm13, %v1938_v48, 0.0 }
  0xf4   :  { %444 = vadd.xlane.f32.xlu1 %v443_v38  ;;  %678 = vadd.xlane.f32.xlu0 %v677_v11  ;;  %v575_v17 = vpop.permute.xlu0 %574  ;;  %v590_v26 = vpop.permute.xlu1 %589  ;;  %v701_v11 = vsel %vm238_vm0, %v636_v27, 0.0 }
  0xf5   :  { %vm610_vm3 = vcmp.eq.s32.totalorder %v1840_v36, %v575_v17  ;;  %vm615_vm15 = vcmp.eq.s32.totalorder %v1840_v36, %v590_v26 }
  0xf6   :  { %v635_v0 = vsel %vm610_vm3, %v1911_v6, 0.0  ;;  %v707_v6 = vsel %vm238_vm0, %v638_v7, 0.0  ;;  %v640_v21 = vsel %vm615_vm15, %v1956_v46, 0.0 }
  0xf7   :  { %v698_v22 = vsel %vm238_vm0, %v635_v0, 0.0  ;;  %v713_v48 = vsel %vm238_vm0, %v640_v21, 0.0 }
  0xf8   :  { %447 = vadd.xlane.f32.xlu1 %v446_v57  ;;  %681 = vadd.xlane.f32.xlu0 %v680_v12  ;;  %v581_v37 = vpop.permute.xlu0 %580 }
  0xf9   :  { %vm612_vm14 = vcmp.eq.s32.totalorder %v1840_v36, %v581_v37 }
  0xfa   :  { %v637_v34 = vsel %vm612_vm14, %v1929_v61, 0.0 }
  0xfb   :  { %v704_v42 = vsel %vm238_vm0, %v637_v34, 0.0 }
  0xfc   :  { %450 = vadd.xlane.f32.xlu1 %v449_v47  ;;  %684 = vadd.xlane.f32.xlu0 %v683_v56  ;;  %v587_v38 = vpop.permute.xlu0 %586 }
  0xfd   :  { %vm614_vm3 = vcmp.eq.s32.totalorder %v1840_v36, %v587_v38 }
  0xfe   :  { %v639_v28 = vsel %vm614_vm3, %v1947_v2, 0.0 }
  0xff   :  { %v710_v30 = vsel %vm238_vm0, %v639_v28, 0.0  ;;  %vm2221_vm0 = vcmp.ne.s32.totalorder %v1514_v3, 4294967196 }
 0x100   :  { %453 = vadd.xlane.f32.xlu1 %v452_v53  ;;  %687 = vadd.xlane.f32.xlu0 %v686_v63 }
 0x104   :  { %456 = vadd.xlane.f32.xlu1 %v455_v5  ;;  %690 = vadd.xlane.f32.xlu0 %v689_v14 }
 0x108   :  { %459 = vadd.xlane.f32.xlu1 %v458_v29  ;;  %693 = vadd.xlane.f32.xlu0 %v692_v13 }
 0x10c   :  { %462 = vadd.xlane.f32.xlu1 %v461_v50  ;;  %696 = vadd.xlane.f32.xlu0 %v695_v41 }
 0x110   :  { %702 = vadd.xlane.f32.xlu0 %v701_v11  ;;  %699 = vadd.xlane.f32.xlu1 %v698_v22 }
 0x114   :  { %708 = vadd.xlane.f32.xlu0 %v707_v6  ;;  %705 = vadd.xlane.f32.xlu1 %v704_v42 }
 0x118   :  { %714 = vadd.xlane.f32.xlu0 %v713_v48  ;;  %711 = vadd.xlane.f32.xlu1 %v710_v30 }
 0x12e   :  { %v391_v61 = vpop.xlane.xlu0 %390 }
 0x12f   :  { %1181 = vlog2.f32 %v391_v61 }
 0x132   :  { %v397_v57 = vpop.xlane.xlu0 %396  ;;  %v394_v12 = vpop.xlane.xlu1 %393 }
 0x133   :  { %1183 = vlog2.f32 %v394_v12 }
 0x134   :  { %1185 = vlog2.f32 %v397_v57 }
 0x136   :  { %v400_v36 = vpop.xlane.xlu0 %399  ;;  %v403_v1 = vpop.xlane.xlu1 %402 }
 0x137   :  { %1187 = vlog2.f32 %v400_v36 }
 0x138   :  { %1189 = vlog2.f32 %v403_v1 }
 0x139   :  { %v1182_v55 = vpop.eup %1181 }
 0x13a   :  { %v406_v54 = vpop.xlane.xlu0 %405  ;;  %v409_v43 = vpop.xlane.xlu1 %408  ;;  %v465_v60 = vmul.f32 0.6931472, %v1182_v55 }
 0x13b   :  { %1191 = vlog2.f32 %v406_v54 }
 0x13c   :  { %1193 = vlog2.f32 %v409_v43 }
 0x13d   :  { %v1184_v39 = vpop.eup %1183 }
 0x13e   :  { %v412_v47 = vpop.xlane.xlu0 %411  ;;  %v1186_v10 = vpop.eup %1185  ;;  %v467_v62 = vmul.f32 0.6931472, %v1184_v39 }
 0x13f   :  { %v469_v17 = vmul.f32 0.6931472, %v1186_v10  ;;  %1195 = vlog2.f32 %v412_v47 }
 0x141   :  { %v1188_v5 = vpop.eup %1187 }
 0x142   :  { %v1190_v13 = vpop.eup %1189  ;;  %v471_v15 = vmul.f32 0.6931472, %v1188_v5 }
 0x143   :  { %v473_v26 = vmul.f32 0.6931472, %v1190_v13 }
 0x145   :  { %v1192_v24 = vpop.eup %1191 }
 0x146   :  { %v475_v38 = vmul.f32 0.6931472, %v1192_v24  ;;  %v1194_v11 = vpop.eup %1193 }
 0x147   :  { %v477_v28 = vmul.f32 0.6931472, %v1194_v11 }
 0x149   :  { %v1196_v21 = vpop.eup %1195 }
 0x14a   :  { %v479_v1 = vmul.f32 0.6931472, %v1196_v21 }
 0x155   :  { %v643_v46 = vpop.xlane.xlu1 %642  ;;  %v646_v56 = vpop.xlane.xlu0 %645 }
 0x156   :  { %v1998_v9 = vsub.f32 %v643_v46, %v465_v60  ;;  %v2000_v14 = vsub.f32 %v646_v56, %v467_v62 }
 0x158   :  { %v741_v4 = vmul.f32 1.442695, %v1998_v9  ;;  %v743_v37 = vmul.f32 1.442695, %v2000_v14 }
 0x159   :  { %v415_v2 = vpop.xlane.xlu1 %414  ;;  %v649_v49 = vpop.xlane.xlu0 %648 }
 0x15a   :  { %v2002_v29 = vsub.f32 %v649_v49, %v469_v17  ;;  %1197 = vlog2.f32 %v415_v2 }
 0x15c   :  { %v745_v27 = vmul.f32 1.442695, %v2002_v29 }
 0x15d   :  { %v418_v53 = vpop.xlane.xlu1 %417  ;;  %v652_v63 = vpop.xlane.xlu0 %651 }
 0x15e   :  { %v2007_v0 = vsub.f32 %v652_v63, %v471_v15  ;;  %1199 = vlog2.f32 %v418_v53 }
 0x15f   :  { %1201 = vpow2.f32 %v741_v4 }
 0x160   :  { %1203 = vpow2.f32 %v743_v37  ;;  %v747_v6 = vmul.f32 1.442695, %v2007_v0 }
 0x161   :  { %v421_v32 = vpop.xlane.xlu1 %420  ;;  %v655_v23 = vpop.xlane.xlu0 %654  ;;  %1205 = vpow2.f32 %v745_v27 }
 0x162   :  { %v2009_v22 = vsub.f32 %v655_v23, %v473_v26  ;;  %1207 = vlog2.f32 %v421_v32 }
 0x163   :  { %1209 = vpow2.f32 %v747_v6 }
 0x164   :  { %v749_v48 = vmul.f32 1.442695, %v2009_v22  ;;  %v1198_v57 = vpop.eup %1197 }
 0x165   :  { %v424_v50 = vpop.xlane.xlu1 %423  ;;  %v658_v41 = vpop.xlane.xlu0 %657  ;;  %v481_v46 = vmul.f32 0.6931472, %v1198_v57 }
 0x166   :  { %v2012_v42 = vsub.f32 %v658_v41, %v475_v38  ;;  %1211 = vlog2.f32 %v424_v50 }
 0x167   :  { %1213 = vpow2.f32 %v749_v48 }
 0x168   :  { %v751_v12 = vmul.f32 1.442695, %v2012_v42  ;;  %v1200_v43 = vpop.eup %1199 }
 0x169   :  { %v427_v7 = vpop.xlane.xlu1 %426  ;;  %v661_v34 = vpop.xlane.xlu0 %660  ;;  %v483_v63 = vmul.f32 0.6931472, %v1200_v43 }
 0x16a   :  { %v2016_v36 = vsub.f32 %v661_v34, %v477_v28  ;;  %v1202_v2 = vpop.eup %1201  ;;  %1215 = vpow2.f32 %v751_v12 }
 0x16b   :  { %v1204_v55 = vpop.eup %1203  ;;  %1217 = vlog2.f32 %v427_v7  ;;  %v791_v5 = vsub.f32 1.0, %v1202_v2 }
 0x16c   :  { %v753_v49 = vmul.f32 1.442695, %v2016_v36  ;;  %v1206_v10 = vpop.eup %1205  ;;  %v792_v32 = vsub.f32 1.0, %v1204_v55 }
 0x16d   :  { %v430_v30 = vpop.xlane.xlu1 %429  ;;  %v664_v61 = vpop.xlane.xlu0 %663  ;;  %v793_v13 = vsub.f32 1.0, %v1206_v10  ;;  %v816_v26 = vmul.f32 %v791_v5, %v1998_v9 }
 0x16e   :  { %v2018_v54 = vsub.f32 %v664_v61, %v479_v1  ;;  %v1208_v60 = vpop.eup %1207  ;;  %1219 = vpow2.f32 %v753_v49  ;;  %v817_v38 = vmul.f32 %v792_v32, %v2000_v14 }
 0x16f   :  { %1221 = vlog2.f32 %v430_v30  ;;  %v1210_v15 = vpop.eup %1209  ;;  %v485_v37 = vmul.f32 0.6931472, %v1208_v60  ;;  %v818_v34 = vmul.f32 %v793_v13, %v2002_v29  ;;  %v841_v12 = vmul.f32 %v816_v26, %v791_v5 }
 0x170   :  { %v755_v53 = vmul.f32 1.442695, %v2018_v54  ;;  %v1212_v50 = vpop.eup %1211  ;;  %v794_v6 = vsub.f32 1.0, %v1210_v15  ;;  %v842_v9 = vmul.f32 %v817_v38, %v792_v32 }
 0x171   :  { %v433_v47 = vpop.xlane.xlu1 %432  ;;  %v667_v56 = vpop.xlane.xlu0 %666  ;;  %v487_v28 = vmul.f32 0.6931472, %v1212_v50  ;;  %v843_v14 = vmul.f32 %v818_v34, %v793_v13 }
 0x172   :  { %v2021_v39 = vsub.f32 %v667_v56, %v481_v46  ;;  %1223 = vpow2.f32 %v755_v53  ;;  %v1214_v7 = vpop.eup %1213  ;;  %v819_v43 = vmul.f32 %v794_v6, %v2007_v0  ;;  %v867_v60 = vsel %vm189_vm2, %v842_v9, 0.0 }
 0x173   :  { %1225 = vlog2.f32 %v433_v47  ;;  %v795_v47 = vsub.f32 1.0, %v1214_v7  ;;  %v868_v0 = vsel %vm190_vm6, %v843_v14, 0.0  ;;  %v944_v26 = vsel %vm942_vm1, %v867_v60, 0.0 }
 0x174   :  { %v757_v4 = vmul.f32 1.442695, %v2021_v39  ;;  %v1216_v21 = vpop.eup %1215  ;;  %vm2222_vm2 = vcmp.ne.s32.totalorder %v1531_v8, 4294967196  ;;  %vm2225_vm6 = vcmp.ne.s32.totalorder %v1582_v44, 4294967196 }
 0x175   :  { %v436_v62 = vpop.xlane.xlu1 %435  ;;  %v670_v17 = vpop.xlane.xlu0 %669  ;;  %v796_v46 = vsub.f32 1.0, %v1216_v21  ;;  %v820_v5 = vmul.f32 %v795_v47, %v2009_v22 }
 0x176   :  { %v2024_v23 = vsub.f32 %v670_v17, %v483_v63  ;;  %1227 = vpow2.f32 %v757_v4  ;;  %v1218_v48 = vpop.eup %1217  ;;  %v866_v63 = vsel %vm188_vm4, %v841_v12, 0.0  ;;  %vm2223_vm4 = vcmp.ne.s32.totalorder %v1548_v25, 4294967196 }
 0x177   :  { %v489_v56 = vmul.f32 0.6931472, %v1218_v48  ;;  %v821_v13 = vmul.f32 %v796_v46, %v2012_v42  ;;  %v943_v20 = vsel %vm942_vm1, %v866_v63, 0.0  ;;  %v845_v38 = vmul.f32 %v820_v5, %v795_v47 }
 0x178   :  { %v759_v24 = vmul.f32 1.442695, %v2024_v23  ;;  %v1220_v29 = vpop.eup %1219  ;;  %v945_v48 = vadd.f32 %v944_v26, %v943_v20 }
 0x179   :  { %v439_v41 = vpop.xlane.xlu1 %438  ;;  %v673_v27 = vpop.xlane.xlu0 %672  ;;  %v797_v4 = vsub.f32 1.0, %v1220_v29  ;;  %v846_v7 = vmul.f32 %v821_v13, %v796_v46 }
 0x17a   :  { %v2030_v11 = vsub.f32 %v673_v27, %v485_v37  ;;  %1229 = vpow2.f32 %v759_v24  ;;  %v1222_v2 = vpop.eup %1221 }
 0x17b   :  { %1231 = vlog2.f32 %v436_v62  ;;  %v844_v62 = vmul.f32 %v819_v43, %v794_v6  ;;  %v491_v18 = vmul.f32 0.6931472, %v1222_v2  ;;  %v822_v34 = vmul.f32 %v797_v4, %v2016_v36 }
 0x17c   :  { %v761_v30 = vmul.f32 1.442695, %v2030_v11  ;;  %v1224_v53 = vpop.eup %1223  ;;  %v870_v36 = vsel %vm192_vm7, %v845_v38, 0.0  ;;  %v871_v29 = vsel %vm193_vm8, %v846_v7, 0.0  ;;  %vm2226_vm7 = vcmp.ne.s32.totalorder %v1602_v51, 4294967196 }
 0x17d   :  { %v442_v61 = vpop.xlane.xlu1 %441  ;;  %v676_v57 = vpop.xlane.xlu0 %675  ;;  %v798_v37 = vsub.f32 1.0, %v1224_v53  ;;  %v869_v42 = vsel %vm191_vm5, %v844_v62, 0.0  ;;  %v847_v46 = vmul.f32 %v822_v34, %v797_v4  ;;  %v950_v62 = vsel %vm942_vm1, %v870_v36, 0.0 }
 0x17e   :  { %v2034_v1 = vsub.f32 %v676_v57, %v487_v28  ;;  %1233 = vpow2.f32 %v761_v30  ;;  %v1226_v32 = vpop.eup %1225  ;;  %vm2224_vm5 = vcmp.ne.s32.totalorder %v1568_v35, 4294967196  ;;  %vm2227_vm8 = vcmp.ne.s32.totalorder %v1613_v59, 4294967196 }
 0x17f   :  { %1235 = vlog2.f32 %v439_v41  ;;  %v946_v41 = vsel %vm942_vm1, %v868_v0, 0.0  ;;  %v493_v21 = vmul.f32 0.6931472, %v1226_v32  ;;  %v823_v30 = vmul.f32 %v798_v37, %v2018_v54 }
 0x180   :  { %v763_v49 = vmul.f32 1.442695, %v2034_v1  ;;  %v1228_v24 = vpop.eup %1227  ;;  %v947_v47 = vadd.f32 %v946_v41, %v945_v48  ;;  %v952_v32 = vsel %vm942_vm1, %v871_v29, 0.0 }
 0x181   :  { %v445_v55 = vpop.xlane.xlu1 %444  ;;  %v679_v10 = vpop.xlane.xlu0 %678  ;;  %v799_v57 = vsub.f32 1.0, %v1228_v24 }
 0x182   :  { %v2042_v17 = vsub.f32 %v679_v10, %v489_v56  ;;  %1237 = vpow2.f32 %v763_v49  ;;  %v848_v49 = vmul.f32 %v823_v30, %v798_v37 }
 0x183   :  { %v824_v10 = vmul.f32 %v799_v57, %v2021_v39  ;;  %v872_v39 = vsel %vm194_vm9, %v847_v46, 0.0 }
 0x184   :  { %v765_v15 = vmul.f32 1.442695, %v2042_v17  ;;  %v1230_v27 = vpop.eup %1229 }
 0x185   :  { %v448_v16 = vpop.xlane.xlu1 %447  ;;  %v682_v50 = vpop.xlane.xlu0 %681  ;;  %v800_v12 = vsub.f32 1.0, %v1230_v27 }
 0x186   :  { %1239 = vpow2.f32 %v765_v15  ;;  %v2051_v22 = vsub.f32 %v682_v50, %v491_v18  ;;  %v1232_v28 = vpop.eup %1231  ;;  %v873_v15 = vsel %vm195_vm10, %v848_v49, 0.0  ;;  %v849_v18 = vmul.f32 %v824_v10, %v799_v57 }
 0x187   :  { %1241 = vlog2.f32 %v442_v61  ;;  %v948_v61 = vsel %vm942_vm1, %v869_v42, 0.0  ;;  %v495_v56 = vmul.f32 0.6931472, %v1232_v28  ;;  %v825_v53 = vmul.f32 %v800_v12, %v2024_v23 }
 0x188   :  { %v767_v6 = vmul.f32 1.442695, %v2051_v22  ;;  %v1234_v19 = vpop.eup %1233  ;;  %v949_v33 = vadd.f32 %v948_v61, %v947_v47  ;;  %v954_v42 = vsel %vm942_vm1, %v872_v39, 0.0 }
 0x189   :  { %v451_v9 = vpop.xlane.xlu1 %450  ;;  %v685_v14 = vpop.xlane.xlu0 %684  ;;  %v801_v0 = vsub.f32 1.0, %v1234_v19  ;;  %v850_v24 = vmul.f32 %v825_v53, %v800_v12 }
 0x18a   :  { %1243 = vpow2.f32 %v767_v6  ;;  %v2059_v43 = vsub.f32 %v685_v14, %v493_v21  ;;  %v1236_v2 = vpop.eup %1235  ;;  %v951_v40 = vadd.f32 %v950_v62, %v949_v33  ;;  %v956_v6 = vsel %vm942_vm1, %v873_v15, 0.0 }
 0x18b   :  { %1245 = vlog2.f32 %v445_v55  ;;  %v497_v13 = vmul.f32 0.6931472, %v1236_v2  ;;  %v826_v50 = vmul.f32 %v801_v0, %v2030_v11  ;;  %v874_v11 = vsel %vm196_vm11, %v849_v18, 0.0 }
 0x18c   :  { %v769_v54 = vmul.f32 1.442695, %v2059_v43  ;;  %1247 = vlog2.f32 %v448_v16  ;;  %v1238_v55 = vpop.eup %1237  ;;  %v953_v34 = vadd.f32 %v952_v32, %v951_v40  ;;  %v875_v21 = vsel %vm197_vm12, %v850_v24, 0.0 }
 0x18d   :  { %v454_v63 = vpop.xlane.xlu1 %453  ;;  %v688_v60 = vpop.xlane.xlu0 %687  ;;  %v802_v27 = vsub.f32 1.0, %v1238_v55  ;;  %v851_v30 = vmul.f32 %v826_v50, %v801_v0  ;;  %v958_v52 = vsel %vm942_vm1, %v874_v11, 0.0 }
 0x18e   :  { %1249 = vpow2.f32 %v769_v54  ;;  %v2069_v31 = vsub.f32 %v688_v60, %v495_v56  ;;  %v955_v14 = vadd.f32 %v954_v42, %v953_v34  ;;  %v960_v54 = vsel %vm942_vm1, %v875_v21, 0.0 }
 0x18f   :  { %1251 = vlog2.f32 %v451_v9  ;;  %v827_v57 = vmul.f32 %v802_v27, %v2034_v1  ;;  %v876_v49 = vsel %vm2221_vm0, %v851_v30, 0.0  ;;  %vm2244_vm0 = vcmask 0  }
 0x190   :  { %v1240_v5 = vpop.eup %1239  ;;  %v771_v23 = vmul.f32 1.442695, %v2069_v31  ;;  %1253 = vlog2.f32 %v454_v63  ;;  %v957_v46 = vadd.f32 %v956_v6, %v955_v14  ;;  %v962_v3 = vsel %vm942_vm1, %v876_v49, 0.0 }
 0x191   :  { %v1242_v4 = vpop.eup %1241  ;;  %v457_v37 = vpop.xlane.xlu1 %456  ;;  %v803_v26 = vsub.f32 1.0, %v1240_v5  ;;  %v852_v10 = vmul.f32 %v827_v57, %v802_v27 }
 0x192   :  { %v691_v16 = vpop.xlane.xlu0 %690  ;;  %1255 = vpow2.f32 %v771_v23  ;;  %v499_v38 = vmul.f32 0.6931472, %v1242_v4  ;;  %v959_v63 = vadd.f32 %v958_v52, %v957_v46 }
 0x193   :  { %v2079_v20 = vsub.f32 %v691_v16, %v497_v13  ;;  %1257 = vlog2.f32 %v457_v37  ;;  %v828_v19 = vmul.f32 %v803_v26, %v2042_v17  ;;  %v877_v18 = vsel %vm2222_vm2, %v852_v10, 0.0 }
 0x194   :  { %v1244_v41 = vpop.eup %1243  ;;  %v961_v39 = vadd.f32 %v960_v54, %v959_v63 }
 0x195   :  { %v773_v45 = vmul.f32 1.442695, %v2079_v20  ;;  %v1246_v7 = vpop.eup %1245  ;;  %v460_v28 = vpop.xlane.xlu1 %459  ;;  %v804_v47 = vsub.f32 1.0, %v1244_v41  ;;  %v853_v60 = vmul.f32 %v828_v19, %v803_v26 }
 0x196   :  { %v694_v48 = vpop.xlane.xlu0 %693  ;;  %v1248_v9 = vpop.eup %1247  ;;  %v501_v36 = vmul.f32 0.6931472, %v1246_v7  ;;  %v963_v42 = vadd.f32 %v962_v3, %v961_v39 }
 0x197   :  { %1259 = vpow2.f32 %v773_v45  ;;  %v2089_v12 = vsub.f32 %v694_v48, %v499_v38  ;;  %v829_v0 = vmul.f32 %v804_v47, %v2051_v22  ;;  %v503_v62 = vmul.f32 0.6931472, %v1248_v9 }
 0x198   :  { %1261 = vlog2.f32 %v460_v28  ;;  %v1250_v61 = vpop.eup %1249  ;;  %v878_v37 = vsel %vm2223_vm4, %v853_v60, 0.0  ;;  %v964_v45 = vsel %vm942_vm1, %v877_v18, 0.0 }
 0x199   :  { %v775_v58 = vmul.f32 1.442695, %v2089_v12  ;;  %v1252_v29 = vpop.eup %1251  ;;  %v805_v1 = vsub.f32 1.0, %v1250_v61  ;;  %v463_v56 = vpop.xlane.xlu1 %462  ;;  %v854_v16 = vmul.f32 %v829_v0, %v804_v47  ;;  %v966_v25 = vsel %vm942_vm1, %v878_v37, 0.0  ;;  %v2230_v37 = vld [vmem:[#allocation9_spill] sm:$0xff] }
 0x19a   :  { %v697_v2 = vpop.xlane.xlu0 %696  ;;  %v1254_v53 = vpop.eup %1253  ;;  %v505_v5 = vmul.f32 0.6931472, %v1252_v29  ;;  %v965_v47 = vadd.f32 %v964_v45, %v963_v42  ;;  %vm2231_vm10 = vcmp.ne.s32.totalorder %v2230_v37, 4294967196 }
 0x19b   :  { %1263 = vpow2.f32 %v775_v58  ;;  %v2097_v17 = vsub.f32 %v697_v2, %v501_v36  ;;  %v830_v23 = vmul.f32 %v805_v1, %v2059_v43  ;;  %v507_v27 = vmul.f32 0.6931472, %v1254_v53 }
 0x19c   :  { %1265 = vlog2.f32 %v463_v56  ;;  %v1256_v55 = vpop.eup %1255  ;;  %v879_v21 = vsel %vm2224_vm5, %v854_v16, 0.0  ;;  %v967_v54 = vadd.f32 %v966_v25, %v965_v47 }
 0x19d   :  { %v777_v33 = vmul.f32 1.442695, %v2097_v17  ;;  %v1258_v32 = vpop.eup %1257  ;;  %v806_v13 = vsub.f32 1.0, %v1256_v55  ;;  %v700_v4 = vpop.xlane.xlu1 %699  ;;  %v855_v38 = vmul.f32 %v830_v23, %v805_v1  ;;  %v968_v35 = vsel %vm942_vm1, %v879_v21, 0.0 }
 0x19e   :  { %v703_v15 = vpop.xlane.xlu0 %702  ;;  %v2105_v22 = vsub.f32 %v700_v4, %v503_v62  ;;  %v509_v41 = vmul.f32 0.6931472, %v1258_v32  ;;  %v969_v53 = vadd.f32 %v968_v35, %v967_v54  ;;  %v2228_v62 = vld [vmem:[#allocation8_spill] sm:$0xff] }
 0x19f   :  { %1267 = vpow2.f32 %v777_v33  ;;  %v2107_v24 = vsub.f32 %v703_v15, %v505_v5  ;;  %v831_v50 = vmul.f32 %v806_v13, %v2069_v31  ;;  %v880_v61 = vsel %vm2225_vm6, %v855_v38, 0.0 }
 0x1a0   :  { %v779_v43 = vmul.f32 1.442695, %v2105_v22  ;;  %v970_v44 = vsel %vm942_vm1, %v880_v61, 0.0  ;;  %vm2229_vm9 = vcmp.ne.s32.totalorder %v2228_v62, 4294967196  ;;  %v2236_v61 = vld [vmem:[#allocation14_spill] sm:$0xff] }
 0x1a1   :  { %v1260_v40 = vpop.eup %1259  ;;  %v781_v26 = vmul.f32 1.442695, %v2107_v24  ;;  %v706_v34 = vpop.xlane.xlu1 %705  ;;  %v856_v28 = vmul.f32 %v831_v50, %v806_v13  ;;  %v971_v51 = vadd.f32 %v970_v44, %v969_v53  ;;  %vm2237_vm13 = vcmp.ne.s32.totalorder %v2236_v61, 4294967196 }
 0x1a2   :  { %v1262_v8 = vpop.eup %1261  ;;  %v807_v7 = vsub.f32 1.0, %v1260_v40  ;;  %v709_v6 = vpop.xlane.xlu0 %708  ;;  %1269 = vpow2.f32 %v779_v43  ;;  %v737_v11 = vsub.f32 %v706_v34, %v507_v27 }
 0x1a3   :  { %v2116_v31 = vsub.f32 %v709_v6, %v509_v41  ;;  %1271 = vpow2.f32 %v781_v26  ;;  %v511_v14 = vmul.f32 0.6931472, %v1262_v8  ;;  %v881_v1 = vsel %vm2226_vm7, %v856_v28, 0.0 }
 0x1a4   :  { %v832_v48 = vmul.f32 %v807_v7, %v2079_v20  ;;  %v783_v57 = vmul.f32 1.442695, %v737_v11  ;;  %v972_v55 = vsel %vm942_vm1, %v881_v1, 0.0 }
 0x1a5   :  { %v1264_v30 = vpop.eup %1263  ;;  %v785_v9 = vmul.f32 1.442695, %v2116_v31  ;;  %v712_v36 = vpop.xlane.xlu1 %711  ;;  %v973_v23 = vadd.f32 %v972_v55, %v971_v51 }
 0x1a6   :  { %v1266_v19 = vpop.eup %1265  ;;  %v857_v52 = vmul.f32 %v832_v48, %v807_v7  ;;  %v808_v58 = vsub.f32 1.0, %v1264_v30  ;;  %v715_v29 = vpop.xlane.xlu0 %714  ;;  %1273 = vpow2.f32 %v783_v57  ;;  %v739_v46 = vsub.f32 %v712_v36, %v511_v14  ;;  %v2232_v7 = vld [vmem:[#allocation10_spill] sm:$0xff] }
 0x1a7   :  { %v513_v20 = vmul.f32 0.6931472, %v1266_v19  ;;  %1275 = vpow2.f32 %v785_v9  ;;  %vm2233_vm11 = vcmp.ne.s32.totalorder %v2232_v7, 4294967196 }
 0x1a8   :  { %v833_v56 = vmul.f32 %v808_v58, %v2089_v12  ;;  %v787_v49 = vmul.f32 1.442695, %v739_v46  ;;  %v882_v63 = vsel %vm2227_vm8, %v857_v52, 0.0 }
 0x1a9   :  { %v1268_v2 = vpop.eup %1267  ;;  %v740_v10 = vsub.f32 %v715_v29, %v513_v20  ;;  %v974_v39 = vsel %vm942_vm1, %v882_v63, 0.0  ;;  %v2238_v29 = vld [vmem:[#allocation16_spill] sm:$0xff] }
 0x1aa   :  { %v858_v60 = vmul.f32 %v833_v56, %v808_v58  ;;  %v809_v0 = vsub.f32 1.0, %v1268_v2  ;;  %1277 = vpow2.f32 %v787_v49  ;;  %v975_v18 = vadd.f32 %v974_v39, %v973_v23  ;;  %v2240_v2 = vld [vmem:[#allocation17_spill] sm:$0xff] }
 0x1ab   :  { %v789_v33 = vmul.f32 1.442695, %v740_v10  ;;  %vm2239_vm14 = vcmp.ne.s32.totalorder %v2238_v29, 4294967196  ;;  %vm2241_vm15 = vcmp.ne.s32.totalorder %v2240_v2, 4294967196 }
 0x1ac   :  { %v883_v12 = vsel %vm2229_vm9, %v858_v60, 0.0  ;;  %v834_v5 = vmul.f32 %v809_v0, %v2097_v17  ;;  %v1270_v32 = vpop.eup %1269 }
 0x1ad   :  { %1279 = vpow2.f32 %v789_v33  ;;  %v1272_v3 = vpop.eup %1271  ;;  %v810_v13 = vsub.f32 1.0, %v1270_v32  ;;  %v976_v4 = vsel %vm942_vm1, %v883_v12, 0.0 }
 0x1ae   :  { %v859_v59 = vmul.f32 %v834_v5, %v809_v0  ;;  %v811_v15 = vsub.f32 1.0, %v1272_v3  ;;  %v977_v26 = vadd.f32 %v976_v4, %v975_v18  ;;  %v941_v5 = vld [vmem:[#allocation2] sm:$0x1]  ;;  %v1067_v3 = vld [vmem:[#allocation3] sm:$0x1] }
 0x1af   :  { %v835_v50 = vmul.f32 %v810_v13, %v2105_v22  ;;  %v2234_v22 = vld [vmem:[#allocation13_spill] sm:$0xff] }
 0x1b0   :  { %v884_v16 = vsel %vm2231_vm10, %v859_v59, 0.0  ;;  %v1274_v27 = vpop.eup %1273  ;;  %v836_v40 = vmul.f32 %v811_v15, %v2107_v24  ;;  %vm2235_vm12 = vcmp.ne.s32.totalorder %v2234_v22, 4294967196 }
 0x1b1   :  { %v978_v17 = vsel %vm942_vm1, %v884_v16, 0.0  ;;  %v1276_v43 = vpop.eup %1275  ;;  %v860_v41 = vmul.f32 %v835_v50, %v810_v13  ;;  %v812_v8 = vsub.f32 1.0, %v1274_v27 }
 0x1b2   :  { %v861_v42 = vmul.f32 %v836_v40, %v811_v15  ;;  %v813_v45 = vsub.f32 1.0, %v1276_v43  ;;  %v979_v38 = vadd.f32 %v978_v17, %v977_v26 }
 0x1b3   :  { %v885_v34 = vsel %vm2233_vm11, %v860_v41, 0.0  ;;  %v837_v6 = vmul.f32 %v812_v8, %v737_v11 }
 0x1b4   :  { %v1278_v25 = vpop.eup %1277  ;;  %v980_v21 = vsel %vm942_vm1, %v885_v34, 0.0  ;;  %v886_v28 = vsel %vm2235_vm12, %v861_v42, 0.0  ;;  %v838_v48 = vmul.f32 %v813_v45, %v2116_v31 }
 0x1b5   :  { %v981_v24 = vadd.f32 %v980_v21, %v979_v38  ;;  %v862_v30 = vmul.f32 %v837_v6, %v812_v8  ;;  %v814_v57 = vsub.f32 1.0, %v1278_v25  ;;  %v982_v14 = vsel %vm942_vm1, %v886_v28, 0.0 }
 0x1b6   :  { %v863_v19 = vmul.f32 %v838_v48, %v813_v45 }
 0x1b7   :  { %v1280_v9 = vpop.eup %1279  ;;  %v983_v47 = vadd.f32 %v982_v14, %v981_v24  ;;  %v887_v52 = vsel %vm2237_vm13, %v862_v30, 0.0  ;;  %v839_v11 = vmul.f32 %v814_v57, %v739_v46  ;;  %v2242_v46 = vld [vmem:[#allocation18_spill] sm:$0xff] }
 0x1b8   :  { %v815_v58 = vsub.f32 1.0, %v1280_v9  ;;  %v984_v36 = vsel %vm942_vm1, %v887_v52, 0.0  ;;  %v888_v35 = vsel %vm2239_vm14, %v863_v19, 0.0  ;;  %vm2243_vm3 = vcmp.ne.s32.totalorder %v2242_v46, 4294967196 }
 0x1b9   :  { %v985_v20 = vadd.f32 %v984_v36, %v983_v47  ;;  %v864_v31 = vmul.f32 %v839_v11, %v814_v57  ;;  %v986_v1 = vsel %vm942_vm1, %v888_v35, 0.0 }
 0x1ba   :  { %v840_v54 = vmul.f32 %v815_v58, %v740_v10 }
 0x1bb   :  { %v987_v56 = vadd.f32 %v986_v1, %v985_v20  ;;  %v889_v44 = vsel %vm2241_vm15, %v864_v31, 0.0 }
 0x1bc   :  { %v865_v49 = vmul.f32 %v840_v54, %v815_v58  ;;  %v988_v53 = vsel %vm942_vm1, %v889_v44, 0.0 }
 0x1bd   :  { %v989_v63 = vadd.f32 %v988_v53, %v987_v56 }
 0x1be   :  { %v890_v60 = vsel %vm2243_vm3, %v865_v49, 0.0 }
 0x1bf   :  { %v990_v0 = vsel %vm942_vm1, %v890_v60, 0.0 }
 0x1c0   :  { %v991_v55 = vadd.f32 %v990_v0, %v989_v63 }
 0x1c2   :  { %v992_v33 = vrot.slane %v991_v55, 4 }
 0x1c4   :  { %v993_v51 = vadd.f32 %v992_v33, %v991_v55 }
 0x1c6   :  { %v994_v62 = vrot.slane %v993_v51, 2 }
 0x1c8   :  { %v995_v10 = vadd.f32 %v994_v62, %v993_v51 }
 0x1ca   :  { %v996_v12 = vrot.slane %v995_v10, 1 }
 0x1cc   :  { %v997_v32 = vadd.f32 %v996_v12, %v995_v10 }
 0x1ce   :  { %v998_v39 = vadd.f32 %v997_v32, %v941_v5 }
 0x1d0   :  { %1000 = vst.msk [vmem:[#allocation2] sm:$0x1] %vm2244_vm0, %v998_v39 }
 0x1d7   :  { %v1062_v23 = vld [vmem:[#allocation2] sm:$0x1] }
 0x1d8   :  { %1122 = vpush %v1062_v23 }
 0x1d9   :  { %1124 = vpush %v1067_v3 }
 0x209   :  { %s1123_s1 = spop %1122 }
 0x20a   :  { %1066 = sst [smem:[#allocation4]] %s1123_s1  ;;  %s1125_s24 = spop %1124 }
 0x20b   :  { %1071 = sst [smem:[#allocation4 + $0x1]] %s1125_s24 }
 0x20c   :  { %1290 = shalt.err (!%p1287_p2)
}
 0x20d   :  { %s1295_s4 = smov [#allocation4]  }
 0x20e   :  { %1079 = dma.smem_to_hbm %s1295_s4, 16, %s2176_s2, [#allocation5]  }
 0x20f   :  { %1291 = dma.done.wait [#allocation5], 16  }
 0x210   :  { %1292 = vsyncadd [#allocation5], 4294967280 }
 0x211   :  { %1083 = sfence }
 0x212   :  { %1084 = vsyncpa [#allocation5], 1 }

</bundles_post_ra>
